<compile_context>
chip_gen: v6e
topology: v6e:2x2x1
jax: 0.10.0
libtpu: 0.0.40
codegen_flags: <defaults>
</compile_context>

<pallas_src>
import functools

import numpy as np
import jax
import jax.numpy as jnp
from jax.experimental import pallas as pl
from jax.experimental.pallas import tpu as pltpu

NEG_FILL = -1e20  # torch masked_fill value in the reference


# --------------------------------------------------------------------------------------
# Fused multi-head attention kernel (BT batch elements per grid step, all heads inside)
# --------------------------------------------------------------------------------------

def _mha_kernel(q_ref, k_ref, v_ref, m_ref,
                wq_ref, wk_ref, wv_ref, wo_ref, bo_ref,
                o_ref, attn_ref, *,
                num_heads, head_size, masked_fill, compute_dtype):
    cdt = compute_dtype
    f32 = jnp.float32
    BT, Lq, D = q_ref.shape
    Lk = k_ref.shape[1]

    q = q_ref[...].astype(cdt)                     # (BT, Lq, D)
    k = k_ref[...].astype(cdt)                     # (BT, Lk, D)
    v = v_ref[...].astype(cdt)                     # (BT, Lk, D)
    valid = m_ref[...] > 0.5                       # (BT, 1, Lk) bool, True = keep

    # Weights arrive already in compute dtype; broadcast once (hoisted out of head loop).
    wq = jnp.broadcast_to(wq_ref[...], (BT, D, D))  # block-diag, scale folded in
    wk = jnp.broadcast_to(wk_ref[...], (BT, D, D))  # block-diag
    wv = jnp.broadcast_to(wv_ref[...], (BT, D, D))  # block-diag
    wo = jnp.broadcast_to(wo_ref[...], (BT, D, D))  # fc_out weight

    # Q/K/V projections: dense batched MXU matmuls (f32 accumulation).
    qp = jnp.einsum('bqd,bde->bqe', q, wq, preferred_element_type=f32)   # (BT, Lq, D), pre-scaled
    kp = jnp.einsum('bkd,bde->bke', k, wk, preferred_element_type=f32)   # (BT, Lk, D)
    vp = jnp.einsum('bkd,bde->bke', v, wv, preferred_element_type=f32)   # (BT, Lk, D)

    fill = jnp.float32(masked_fill)                # == -1e20 / sqrt(embed_dim)
    ctx_parts = []
    for h in range(num_heads):                     # static unroll (H is small)
        sl = slice(h * head_size, (h + 1) * head_size)
        qh = qp[..., sl].astype(cdt)               # (BT, Lq, hs)
        kh = kp[..., sl].astype(cdt)               # (BT, Lk, hs)
        vh = vp[..., sl].astype(cdt)               # (BT, Lk, hs)

        # logits = masked_fill(q.k, -1e20) / sqrt(D)  (scale already folded into qh)
        e = jnp.einsum('bqd,bkd->bqk', qh, kh, preferred_element_type=f32)   # (BT, Lq, Lk)
        logits = jnp.where(valid, e, fill)
        logits = logits - jnp.max(logits, axis=-1, keepdims=True)
        p = jnp.exp(logits)
        denom = jnp.sum(p, axis=-1, keepdims=True)
        if jnp.dtype(cdt) == jnp.dtype(jnp.float32):
            p = p / denom
        else:
            p = p * pl.reciprocal(denom, approx=True)                        # EUP slot, ~free
        attn_ref[:, h] = p                                                   # (BT, Lq, Lk)

        ctx_parts.append(
            jnp.einsum('bqk,bkd->bqd', p.astype(cdt), vh, preferred_element_type=f32))

    # Concatenate heads along lanes (same as the torch reshape) and apply fc_out once.
    ctx = jnp.concatenate(ctx_parts, axis=-1).astype(cdt)                    # (BT, Lq, D)
    out = jnp.einsum('bqd,bde->bqe', ctx, wo, preferred_element_type=f32)    # (BT, Lq, D)
    o_ref[...] = (out + bo_ref[...]).astype(o_ref.dtype)                     # lane-dense store


def _pick_batch_tile(n, cap=8):
    for bt in range(min(n, cap), 0, -1):
        if n % bt == 0:
            return bt
    return 1


def mha_forward(params, values, keys, query, mask, *, num_heads,
                compute_dtype=jnp.bfloat16, batch_tile=None):
    """Pallas forward of MultiHeadAttention.
    values/keys: (N, Lk, D), query: (N, Lq, D), mask: (N, Lk) bool or None.
    Returns (out (N, Lq, D) f32, attention (N, H, Lq, Lk) f32)."""
    N, Lq, D = query.shape
    Lk = keys.shape[1]
    hs = D // num_heads
    assert hs * num_heads == D
    scale = 1.0 / float(np.sqrt(D))

    if mask is None:
        mask = jnp.ones((N, Lk), dtype=bool)
    mask_f = mask.astype(jnp.float32).reshape(N, 1, Lk)

    bt = batch_tile if batch_tile is not None else _pick_batch_tile(N)
    assert N % bt == 0, "batch must be divisible by the batch tile"

    kernel = functools.partial(
        _mha_kernel, num_heads=num_heads, head_size=hs,
        masked_fill=float(NEG_FILL) * scale, compute_dtype=compute_dtype)

    # Pre-cast (tiny) weights to the compute dtype once; bias stays f32.
    wq = params['wq_bd_scaled'].astype(compute_dtype)
    wk = params['wk_bd'].astype(compute_dtype)
    wv = params['wv_bd'].astype(compute_dtype)
    wo = params['wo'].astype(compute_dtype)
    bo = params['bo'].reshape(1, D).astype(jnp.float32)

    out, attn = pl.pallas_call(
        kernel,
        out_shape=(jax.ShapeDtypeStruct((N, Lq, D), jnp.float32),
                   jax.ShapeDtypeStruct((N, num_heads, Lq, Lk), jnp.float32)),
        grid=(N // bt,),
        in_specs=[
            pl.BlockSpec((bt, Lq, D), lambda n: (n, 0, 0)),       # query
            pl.BlockSpec((bt, Lk, D), lambda n: (n, 0, 0)),       # keys
            pl.BlockSpec((bt, Lk, D), lambda n: (n, 0, 0)),       # values
            pl.BlockSpec((bt, 1, Lk), lambda n: (n, 0, 0)),       # mask
            pl.BlockSpec((D, D), lambda n: (0, 0)),               # Wq (block-diag, pre-scaled)
            pl.BlockSpec((D, D), lambda n: (0, 0)),               # Wk (block-diag)
            pl.BlockSpec((D, D), lambda n: (0, 0)),               # Wv (block-diag)
            pl.BlockSpec((D, D), lambda n: (0, 0)),               # Wo
            pl.BlockSpec((1, D), lambda n: (0, 0)),               # bo
        ],
        out_specs=(pl.BlockSpec((bt, Lq, D), lambda n: (n, 0, 0)),
                   pl.BlockSpec((bt, num_heads, Lq, Lk), lambda n: (n, 0, 0, 0))),
        compiler_params=pltpu.CompilerParams(dimension_semantics=("parallel",)),
    )(query.astype(jnp.float32), keys.astype(jnp.float32), values.astype(jnp.float32),
      mask_f, wq, wk, wv, wo, bo)
    return out, attn


# --------------------------------------------------------------------------------------
# Parameters (PyTorch convention: per-head Linear(hs, hs, bias=False) shared across heads,
# fc_out = Linear(D, D).  Weights stored pre-transposed as (in, out) so y = x @ W.)
# --------------------------------------------------------------------------------------

def init_params(key, embed_dim, num_heads):
    hs = embed_dim // num_heads
    k1, k2, k3, k4, k5 = jax.random.split(key, 5)

    def unif(k, shape, fan_in):
        bound = 1.0 / np.sqrt(fan_in)
        return jax.random.uniform(k, shape, jnp.float32, -bound, bound)

    wq = unif(k1, (hs, hs), hs)
    wk = unif(k2, (hs, hs), hs)
    wv = unif(k3, (hs, hs), hs)
    wo = unif(k4, (embed_dim, embed_dim), embed_dim)
    bo = unif(k5, (embed_dim,), embed_dim)

    # Fold the shared per-head projection into a block-diagonal (D, D) matrix at init
    # (single dense MXU matmul in the kernel; exactly equivalent to the per-head Linear).
    def block_diag(w):
        bd = np.zeros((embed_dim, embed_dim), np.float32)
        w_np = np.asarray(w)
        for h in range(num_heads):
            bd[h * hs:(h + 1) * hs, h * hs:(h + 1) * hs] = w_np
        return jnp.asarray(bd)

    scale = 1.0 / float(np.sqrt(embed_dim))
    return dict(wq=wq, wk=wk, wv=wv, wo=wo, bo=bo,
                wq_bd_scaled=block_diag(wq) * scale,   # softmax scale folded at init
                wk_bd=block_diag(wk),
                wv_bd=block_diag(wv))


# --------------------------------------------------------------------------------------
# Pure-JAX reference (mirrors the PyTorch module exactly) for a tolerance check
# --------------------------------------------------------------------------------------

def mha_reference(params, values, keys, query, mask, num_heads):
    N, Lq, D = query.shape
    Lk = keys.shape[1]
    hs = D // num_heads
    v = values.reshape(N, Lk, num_heads, hs) @ params['wv']
    k = keys.reshape(N, Lk, num_heads, hs) @ params['wk']
    q = query.reshape(N, Lq, num_heads, hs) @ params['wq']
    energy = jnp.einsum('nqhd,nkhd->nhqk', q, k)
    if mask is not None:
        energy = jnp.where(mask[:, None, None, :], energy, jnp.float32(NEG_FILL))
    attn = jax.nn.softmax(energy / np.sqrt(D), axis=-1)
    out = jnp.einsum('nhql,nlhd->nqhd', attn, v).reshape(N, Lq, D)
    out = out @ params['wo'] + params['bo']
    return out, attn


if __name__ == "__main__":
    embed_dim, num_heads = 32, 4            # head_size = 8
    N, Lq, Lk = 4, 8, 8

    root = jax.random.PRNGKey(0)
    kp, kv, kk, kq = jax.random.split(root, 4)
    params = init_params(kp, embed_dim, num_heads)

    values = jax.random.normal(kv, (N, Lk, embed_dim), jnp.float32)
    keys_in = jax.random.normal(kk, (N, Lk, embed_dim), jnp.float32)
    query = jax.random.normal(kq, (N, Lq, embed_dim), jnp.float32)
    mask = jnp.array([[True] * Lk,
                      [True] * (Lk - 3) + [False] * 3,
                      [True] * (Lk - 1) + [False],
                      [True] * Lk])                                        # (N, Lk) bool

    ref_out, ref_attn = mha_reference(params, values, keys_in, query, mask, num_heads)

    # bf16-operand fast path (default batch tile covers the whole small batch) ------------
    fwd_bf16 = jax.jit(functools.partial(mha_forward, params, num_heads=num_heads,
                                         compute_dtype=jnp.bfloat16))
    out, attn = fwd_bf16(values, keys_in, query, mask)
    out = jax.block_until_ready(out)
    attn = jax.block_until_ready(attn)

    assert out.shape == (N, Lq, embed_dim)
    assert attn.shape == (N, num_heads, Lq, Lk)
    assert bool(jnp.all(jnp.isfinite(out))) and bool(jnp.all(jnp.isfinite(attn)))
    assert bool(jnp.allclose(out, ref_out, atol=5e-2, rtol=5e-2))
    assert bool(jnp.allclose(attn, ref_attn, atol=5e-2, rtol=5e-2))
    # masked key positions must get ~zero attention
    assert bool(jnp.all(attn[1, :, :, Lk - 3:] < 1e-6))
    assert bool(jnp.all(attn[2, :, :, Lk - 1:] < 1e-6))

    # f32 path with an explicit smaller batch tile (exercises a multi-step grid) ----------
    fwd_f32 = jax.jit(functools.partial(mha_forward, params, num_heads=num_heads,
                                        compute_dtype=jnp.float32, batch_tile=2))
    out32, attn32 = fwd_f32(values, keys_in, query, mask)
    out32 = jax.block_until_ready(out32)
    attn32 = jax.block_until_ready(attn32)
    assert bool(jnp.allclose(out32, ref_out, atol=1e-3, rtol=1e-3))
    assert bool(jnp.allclose(attn32, ref_attn, atol=1e-3, rtol=1e-3))
    assert bool(jnp.all(attn32[1, :, :, Lk - 3:] < 1e-6))

    print("KERNEL_OK")
</pallas_src>

<mosaic_0001>
module attributes {stable_mosaic.version = 11 : i64} {
  func.func @_mha_kernel(%arg0: i32, %arg1: memref<4x8x32xf32, #tpu.memory_space<vmem>>, %arg2: memref<4x8x32xf32, #tpu.memory_space<vmem>>, %arg3: memref<4x8x32xf32, #tpu.memory_space<vmem>>, %arg4: memref<4x1x8xf32, #tpu.memory_space<vmem>>, %arg5: memref<32x32xbf16, #tpu.memory_space<vmem>>, %arg6: memref<32x32xbf16, #tpu.memory_space<vmem>>, %arg7: memref<32x32xbf16, #tpu.memory_space<vmem>>, %arg8: memref<32x32xbf16, #tpu.memory_space<vmem>>, %arg9: memref<1x32xf32, #tpu.memory_space<vmem>>, %arg10: memref<4x8x32xf32, #tpu.memory_space<vmem>>, %arg11: memref<4x4x8x8xf32, #tpu.memory_space<vmem>>) attributes {dimension_semantics = [#tpu.dimension_semantics<parallel>], iteration_bounds = array<i64: 1>, scalar_prefetch = 0 : i64, scratch_operands = 0 : i64, tpu.core_type = #tpu.core_type<tc>, window_params = [{transform_indices = @transform_0, window_bounds = array<i64: 4, 8, 32>}, {transform_indices = @transform_1, window_bounds = array<i64: 4, 8, 32>}, {transform_indices = @transform_2, window_bounds = array<i64: 4, 8, 32>}, {transform_indices = @transform_3, window_bounds = array<i64: 4, 1, 8>}, {pipeline_mode = #tpu.pipeline_mode<synchronous>, transform_indices = @transform_4, window_bounds = array<i64: 32, 32>}, {pipeline_mode = #tpu.pipeline_mode<synchronous>, transform_indices = @transform_5, window_bounds = array<i64: 32, 32>}, {pipeline_mode = #tpu.pipeline_mode<synchronous>, transform_indices = @transform_6, window_bounds = array<i64: 32, 32>}, {pipeline_mode = #tpu.pipeline_mode<synchronous>, transform_indices = @transform_7, window_bounds = array<i64: 32, 32>}, {pipeline_mode = #tpu.pipeline_mode<synchronous>, transform_indices = @transform_8, window_bounds = array<i64: 1, 32>}, {transform_indices = @transform_9, window_bounds = array<i64: 4, 8, 32>}, {transform_indices = @transform_10, window_bounds = array<i64: 4, 4, 8, 8>}]} {
    %c0 = arith.constant 0 : index
    %c0_0 = arith.constant 0 : index
    %c0_1 = arith.constant 0 : index
    %0 = vector.load %arg1[%c0, %c0_0, %c0_1] : memref<4x8x32xf32, #tpu.memory_space<vmem>>, vector<4x8x32xf32>
    %1 = arith.truncf %0 : vector<4x8x32xf32> to vector<4x8x32xbf16>
    %c0_2 = arith.constant 0 : index
    %c0_3 = arith.constant 0 : index
    %c0_4 = arith.constant 0 : index
    %2 = vector.load %arg2[%c0_2, %c0_3, %c0_4] : memref<4x8x32xf32, #tpu.memory_space<vmem>>, vector<4x8x32xf32>
    %3 = arith.truncf %2 : vector<4x8x32xf32> to vector<4x8x32xbf16>
    %c0_5 = arith.constant 0 : index
    %c0_6 = arith.constant 0 : index
    %c0_7 = arith.constant 0 : index
    %4 = vector.load %arg3[%c0_5, %c0_6, %c0_7] : memref<4x8x32xf32, #tpu.memory_space<vmem>>, vector<4x8x32xf32>
    %5 = arith.truncf %4 : vector<4x8x32xf32> to vector<4x8x32xbf16>
    %c0_8 = arith.constant 0 : index
    %c0_9 = arith.constant 0 : index
    %c0_10 = arith.constant 0 : index
    %6 = vector.load %arg4[%c0_8, %c0_9, %c0_10] : memref<4x1x8xf32, #tpu.memory_space<vmem>>, vector<4x1x8xf32>
    %cst = arith.constant 5.000000e-01 : f32
    %7 = vector.broadcast %cst : f32 to vector<4x1x8xf32>
    %8 = arith.cmpf ogt, %6, %7 : vector<4x1x8xf32>
    %c0_11 = arith.constant 0 : index
    %c0_12 = arith.constant 0 : index
    %9 = vector.load %arg5[%c0_11, %c0_12] : memref<32x32xbf16, #tpu.memory_space<vmem>>, vector<32x32xbf16>
    %10 = vector.shape_cast %9 : vector<32x32xbf16> to vector<1x32x32xbf16>
    %11 = vector.broadcast %10 : vector<1x32x32xbf16> to vector<4x32x32xbf16>
    %c0_13 = arith.constant 0 : index
    %c0_14 = arith.constant 0 : index
    %12 = vector.load %arg6[%c0_13, %c0_14] : memref<32x32xbf16, #tpu.memory_space<vmem>>, vector<32x32xbf16>
    %13 = vector.shape_cast %12 : vector<32x32xbf16> to vector<1x32x32xbf16>
    %14 = vector.broadcast %13 : vector<1x32x32xbf16> to vector<4x32x32xbf16>
    %c0_15 = arith.constant 0 : index
    %c0_16 = arith.constant 0 : index
    %15 = vector.load %arg7[%c0_15, %c0_16] : memref<32x32xbf16, #tpu.memory_space<vmem>>, vector<32x32xbf16>
    %16 = vector.shape_cast %15 : vector<32x32xbf16> to vector<1x32x32xbf16>
    %17 = vector.broadcast %16 : vector<1x32x32xbf16> to vector<4x32x32xbf16>
    %c0_17 = arith.constant 0 : index
    %c0_18 = arith.constant 0 : index
    %18 = vector.load %arg8[%c0_17, %c0_18] : memref<32x32xbf16, #tpu.memory_space<vmem>>, vector<32x32xbf16>
    %19 = vector.shape_cast %18 : vector<32x32xbf16> to vector<1x32x32xbf16>
    %20 = vector.broadcast %19 : vector<1x32x32xbf16> to vector<4x32x32xbf16>
    "tpu.trace_start"() <{level = 10 : i32, message = "bqd,bde->bqe"}> : () -> ()
    %cst_19 = arith.constant dense<0.000000e+00> : vector<4x8x32xf32>
    %21 = tpu.matmul %1, %11, %cst_19 {dimension_numbers = #tpu.dot_dimension_numbers<[2], [1], [1], [2], [0, 0, 0, 1, 1, 2], [0], [0]>} : vector<4x8x32xbf16>, vector<4x32x32xbf16>, vector<4x8x32xf32> -> vector<4x8x32xf32>
    "tpu.trace_stop"() : () -> ()
    "tpu.trace_start"() <{level = 10 : i32, message = "bkd,bde->bke"}> : () -> ()
    %cst_20 = arith.constant dense<0.000000e+00> : vector<4x8x32xf32>
    %22 = tpu.matmul %3, %14, %cst_20 {dimension_numbers = #tpu.dot_dimension_numbers<[2], [1], [1], [2], [0, 0, 0, 1, 1, 2], [0], [0]>} : vector<4x8x32xbf16>, vector<4x32x32xbf16>, vector<4x8x32xf32> -> vector<4x8x32xf32>
    %cst_21 = arith.constant dense<0.000000e+00> : vector<4x8x32xf32>
    %23 = tpu.matmul %5, %17, %cst_21 {dimension_numbers = #tpu.dot_dimension_numbers<[2], [1], [1], [2], [0, 0, 0, 1, 1, 2], [0], [0]>} : vector<4x8x32xbf16>, vector<4x32x32xbf16>, vector<4x8x32xf32> -> vector<4x8x32xf32>
    "tpu.trace_stop"() : () -> ()
    %24 = vector.extract_strided_slice %21 {offsets = [0, 0, 0], sizes = [4, 8, 8], strides = [1, 1, 1]} : vector<4x8x32xf32> to vector<4x8x8xf32>
    %25 = arith.truncf %24 : vector<4x8x8xf32> to vector<4x8x8xbf16>
    %26 = vector.extract_strided_slice %22 {offsets = [0, 0, 0], sizes = [4, 8, 8], strides = [1, 1, 1]} : vector<4x8x32xf32> to vector<4x8x8xf32>
    %27 = arith.truncf %26 : vector<4x8x8xf32> to vector<4x8x8xbf16>
    %28 = vector.extract_strided_slice %23 {offsets = [0, 0, 0], sizes = [4, 8, 8], strides = [1, 1, 1]} : vector<4x8x32xf32> to vector<4x8x8xf32>
    %29 = arith.truncf %28 : vector<4x8x8xf32> to vector<4x8x8xbf16>
    "tpu.trace_start"() <{level = 10 : i32, message = "bqd,bkd->bqk"}> : () -> ()
    %cst_22 = arith.constant dense<0.000000e+00> : vector<4x8x8xf32>
    %30 = tpu.matmul %25, %27, %cst_22 {dimension_numbers = #tpu.dot_dimension_numbers<[2], [2], [1], [1], [0, 0, 0, 1, 1, 1], [0], [0]>} : vector<4x8x8xbf16>, vector<4x8x8xbf16>, vector<4x8x8xf32> -> vector<4x8x8xf32>
    %cst_23 = arith.constant -1.76776698E+19 : f32
    "tpu.trace_stop"() : () -> ()
    %31 = vector.shape_cast %8 : vector<4x1x8xi1> to vector<4x1x8xi1>
    %32 = vector.broadcast %31 : vector<4x1x8xi1> to vector<4x8x8xi1>
    %33 = vector.broadcast %cst_23 : f32 to vector<4x8x8xf32>
    %34 = arith.select %32, %30, %33 : vector<4x8x8xi1>, vector<4x8x8xf32>
    %cst_24 = arith.constant dense<0xFF800000> : vector<4x8xf32>
    %35 = vector.multi_reduction <maximumf>, %34, %cst_24 [2] : vector<4x8x8xf32> to vector<4x8xf32>
    %36 = vector.shape_cast %35 : vector<4x8xf32> to vector<4x8x1xf32>
    %37 = vector.broadcast %36 : vector<4x8x1xf32> to vector<4x8x8xf32>
    %38 = arith.subf %34, %37 : vector<4x8x8xf32>
    %39 = math.exp %38 : vector<4x8x8xf32>
    %cst_25 = arith.constant dense<0.000000e+00> : vector<4x8xf32>
    %40 = vector.multi_reduction <add>, %39, %cst_25 [2] : vector<4x8x8xf32> to vector<4x8xf32>
    %41 = vector.shape_cast %40 : vector<4x8xf32> to vector<4x8x1xf32>
    %42 = tpu.reciprocal %41 {approx = true} : vector<4x8x1xf32> -> vector<4x8x1xf32>
    %43 = vector.broadcast %42 : vector<4x8x1xf32> to vector<4x8x8xf32>
    %44 = arith.mulf %39, %43 : vector<4x8x8xf32>
    %c0_26 = arith.constant 0 : index
    %c0_27 = arith.constant 0 : index
    %c0_28 = arith.constant 0 : index
    %c0_29 = arith.constant 0 : index
    %45 = vector.load %arg11[%c0_26, %c0_27, %c0_28, %c0_29] : memref<4x4x8x8xf32, #tpu.memory_space<vmem>>, vector<4x1x8x8xf32>
    %46 = vector.shape_cast %45 : vector<4x1x8x8xf32> to vector<4x8x8xf32>
    %47 = vector.shape_cast %44 : vector<4x8x8xf32> to vector<4x1x8x8xf32>
    tpu.vector_store %arg11[%c0_26, %c0_27, %c0_28, %c0_29], %47 {strides = array<i32>} : memref<4x4x8x8xf32, #tpu.memory_space<vmem>>, vector<4x1x8x8xf32>,
    %48 = arith.truncf %44 : vector<4x8x8xf32> to vector<4x8x8xbf16>
    "tpu.trace_start"() <{level = 10 : i32, message = "bqk,bkd->bqd"}> : () -> ()
    %cst_30 = arith.constant dense<0.000000e+00> : vector<4x8x8xf32>
    %49 = tpu.matmul %48, %29, %cst_30 {dimension_numbers = #tpu.dot_dimension_numbers<[2], [1], [1], [2], [0, 0, 0, 1, 1, 2], [0], [0]>} : vector<4x8x8xbf16>, vector<4x8x8xbf16>, vector<4x8x8xf32> -> vector<4x8x8xf32>
    "tpu.trace_stop"() : () -> ()
    %50 = vector.extract_strided_slice %21 {offsets = [0, 0, 8], sizes = [4, 8, 8], strides = [1, 1, 1]} : vector<4x8x32xf32> to vector<4x8x8xf32>
    %51 = arith.truncf %50 : vector<4x8x8xf32> to vector<4x8x8xbf16>
    %52 = vector.extract_strided_slice %22 {offsets = [0, 0, 8], sizes = [4, 8, 8], strides = [1, 1, 1]} : vector<4x8x32xf32> to vector<4x8x8xf32>
    %53 = arith.truncf %52 : vector<4x8x8xf32> to vector<4x8x8xbf16>
    %54 = vector.extract_strided_slice %23 {offsets = [0, 0, 8], sizes = [4, 8, 8], strides = [1, 1, 1]} : vector<4x8x32xf32> to vector<4x8x8xf32>
    %55 = arith.truncf %54 : vector<4x8x8xf32> to vector<4x8x8xbf16>
    "tpu.trace_start"() <{level = 10 : i32, message = "bqd,bkd->bqk"}> : () -> ()
    %cst_31 = arith.constant dense<0.000000e+00> : vector<4x8x8xf32>
    %56 = tpu.matmul %51, %53, %cst_31 {dimension_numbers = #tpu.dot_dimension_numbers<[2], [2], [1], [1], [0, 0, 0, 1, 1, 1], [0], [0]>} : vector<4x8x8xbf16>, vector<4x8x8xbf16>, vector<4x8x8xf32> -> vector<4x8x8xf32>
    %cst_32 = arith.constant -1.76776698E+19 : f32
    "tpu.trace_stop"() : () -> ()
    %57 = vector.shape_cast %8 : vector<4x1x8xi1> to vector<4x1x8xi1>
    %58 = vector.broadcast %57 : vector<4x1x8xi1> to vector<4x8x8xi1>
    %59 = vector.broadcast %cst_32 : f32 to vector<4x8x8xf32>
    %60 = arith.select %58, %56, %59 : vector<4x8x8xi1>, vector<4x8x8xf32>
    %cst_33 = arith.constant dense<0xFF800000> : vector<4x8xf32>
    %61 = vector.multi_reduction <maximumf>, %60, %cst_33 [2] : vector<4x8x8xf32> to vector<4x8xf32>
    %62 = vector.shape_cast %61 : vector<4x8xf32> to vector<4x8x1xf32>
    %63 = vector.broadcast %62 : vector<4x8x1xf32> to vector<4x8x8xf32>
    %64 = arith.subf %60, %63 : vector<4x8x8xf32>
    %65 = math.exp %64 : vector<4x8x8xf32>
    %cst_34 = arith.constant dense<0.000000e+00> : vector<4x8xf32>
    %66 = vector.multi_reduction <add>, %65, %cst_34 [2] : vector<4x8x8xf32> to vector<4x8xf32>
    %67 = vector.shape_cast %66 : vector<4x8xf32> to vector<4x8x1xf32>
    %68 = tpu.reciprocal %67 {approx = true} : vector<4x8x1xf32> -> vector<4x8x1xf32>
    %69 = vector.broadcast %68 : vector<4x8x1xf32> to vector<4x8x8xf32>
    %70 = arith.mulf %65, %69 : vector<4x8x8xf32>
    %c0_35 = arith.constant 0 : index
    %c1 = arith.constant 1 : index
    %c0_36 = arith.constant 0 : index
    %c0_37 = arith.constant 0 : index
    %71 = vector.load %arg11[%c0_35, %c1, %c0_36, %c0_37] : memref<4x4x8x8xf32, #tpu.memory_space<vmem>>, vector<4x1x8x8xf32>
    %72 = vector.shape_cast %71 : vector<4x1x8x8xf32> to vector<4x8x8xf32>
    %73 = vector.shape_cast %70 : vector<4x8x8xf32> to vector<4x1x8x8xf32>
    tpu.vector_store %arg11[%c0_35, %c1, %c0_36, %c0_37], %73 {strides = array<i32>} : memref<4x4x8x8xf32, #tpu.memory_space<vmem>>, vector<4x1x8x8xf32>,
    %74 = arith.truncf %70 : vector<4x8x8xf32> to vector<4x8x8xbf16>
    "tpu.trace_start"() <{level = 10 : i32, message = "bqk,bkd->bqd"}> : () -> ()
    %cst_38 = arith.constant dense<0.000000e+00> : vector<4x8x8xf32>
    %75 = tpu.matmul %74, %55, %cst_38 {dimension_numbers = #tpu.dot_dimension_numbers<[2], [1], [1], [2], [0, 0, 0, 1, 1, 2], [0], [0]>} : vector<4x8x8xbf16>, vector<4x8x8xbf16>, vector<4x8x8xf32> -> vector<4x8x8xf32>
    "tpu.trace_stop"() : () -> ()
    %76 = vector.extract_strided_slice %21 {offsets = [0, 0, 16], sizes = [4, 8, 8], strides = [1, 1, 1]} : vector<4x8x32xf32> to vector<4x8x8xf32>
    %77 = arith.truncf %76 : vector<4x8x8xf32> to vector<4x8x8xbf16>
    %78 = vector.extract_strided_slice %22 {offsets = [0, 0, 16], sizes = [4, 8, 8], strides = [1, 1, 1]} : vector<4x8x32xf32> to vector<4x8x8xf32>
    %79 = arith.truncf %78 : vector<4x8x8xf32> to vector<4x8x8xbf16>
    %80 = vector.extract_strided_slice %23 {offsets = [0, 0, 16], sizes = [4, 8, 8], strides = [1, 1, 1]} : vector<4x8x32xf32> to vector<4x8x8xf32>
    %81 = arith.truncf %80 : vector<4x8x8xf32> to vector<4x8x8xbf16>
    "tpu.trace_start"() <{level = 10 : i32, message = "bqd,bkd->bqk"}> : () -> ()
    %cst_39 = arith.constant dense<0.000000e+00> : vector<4x8x8xf32>
    %82 = tpu.matmul %77, %79, %cst_39 {dimension_numbers = #tpu.dot_dimension_numbers<[2], [2], [1], [1], [0, 0, 0, 1, 1, 1], [0], [0]>} : vector<4x8x8xbf16>, vector<4x8x8xbf16>, vector<4x8x8xf32> -> vector<4x8x8xf32>
    %cst_40 = arith.constant -1.76776698E+19 : f32
    "tpu.trace_stop"() : () -> ()
    %83 = vector.shape_cast %8 : vector<4x1x8xi1> to vector<4x1x8xi1>
    %84 = vector.broadcast %83 : vector<4x1x8xi1> to vector<4x8x8xi1>
    %85 = vector.broadcast %cst_40 : f32 to vector<4x8x8xf32>
    %86 = arith.select %84, %82, %85 : vector<4x8x8xi1>, vector<4x8x8xf32>
    %cst_41 = arith.constant dense<0xFF800000> : vector<4x8xf32>
    %87 = vector.multi_reduction <maximumf>, %86, %cst_41 [2] : vector<4x8x8xf32> to vector<4x8xf32>
    %88 = vector.shape_cast %87 : vector<4x8xf32> to vector<4x8x1xf32>
    %89 = vector.broadcast %88 : vector<4x8x1xf32> to vector<4x8x8xf32>
    %90 = arith.subf %86, %89 : vector<4x8x8xf32>
    %91 = math.exp %90 : vector<4x8x8xf32>
    %cst_42 = arith.constant dense<0.000000e+00> : vector<4x8xf32>
    %92 = vector.multi_reduction <add>, %91, %cst_42 [2] : vector<4x8x8xf32> to vector<4x8xf32>
    %93 = vector.shape_cast %92 : vector<4x8xf32> to vector<4x8x1xf32>
    %94 = tpu.reciprocal %93 {approx = true} : vector<4x8x1xf32> -> vector<4x8x1xf32>
    %95 = vector.broadcast %94 : vector<4x8x1xf32> to vector<4x8x8xf32>
    %96 = arith.mulf %91, %95 : vector<4x8x8xf32>
    %c0_43 = arith.constant 0 : index
    %c2 = arith.constant 2 : index
    %c0_44 = arith.constant 0 : index
    %c0_45 = arith.constant 0 : index
    %97 = vector.load %arg11[%c0_43, %c2, %c0_44, %c0_45] : memref<4x4x8x8xf32, #tpu.memory_space<vmem>>, vector<4x1x8x8xf32>
    %98 = vector.shape_cast %97 : vector<4x1x8x8xf32> to vector<4x8x8xf32>
    %99 = vector.shape_cast %96 : vector<4x8x8xf32> to vector<4x1x8x8xf32>
    tpu.vector_store %arg11[%c0_43, %c2, %c0_44, %c0_45], %99 {strides = array<i32>} : memref<4x4x8x8xf32, #tpu.memory_space<vmem>>, vector<4x1x8x8xf32>,
    %100 = arith.truncf %96 : vector<4x8x8xf32> to vector<4x8x8xbf16>
    "tpu.trace_start"() <{level = 10 : i32, message = "bqk,bkd->bqd"}> : () -> ()
    %cst_46 = arith.constant dense<0.000000e+00> : vector<4x8x8xf32>
    %101 = tpu.matmul %100, %81, %cst_46 {dimension_numbers = #tpu.dot_dimension_numbers<[2], [1], [1], [2], [0, 0, 0, 1, 1, 2], [0], [0]>} : vector<4x8x8xbf16>, vector<4x8x8xbf16>, vector<4x8x8xf32> -> vector<4x8x8xf32>
    "tpu.trace_stop"() : () -> ()
    %102 = vector.extract_strided_slice %21 {offsets = [0, 0, 24], sizes = [4, 8, 8], strides = [1, 1, 1]} : vector<4x8x32xf32> to vector<4x8x8xf32>
    %103 = arith.truncf %102 : vector<4x8x8xf32> to vector<4x8x8xbf16>
    %104 = vector.extract_strided_slice %22 {offsets = [0, 0, 24], sizes = [4, 8, 8], strides = [1, 1, 1]} : vector<4x8x32xf32> to vector<4x8x8xf32>
    %105 = arith.truncf %104 : vector<4x8x8xf32> to vector<4x8x8xbf16>
    %106 = vector.extract_strided_slice %23 {offsets = [0, 0, 24], sizes = [4, 8, 8], strides = [1, 1, 1]} : vector<4x8x32xf32> to vector<4x8x8xf32>
    %107 = arith.truncf %106 : vector<4x8x8xf32> to vector<4x8x8xbf16>
    "tpu.trace_start"() <{level = 10 : i32, message = "bqd,bkd->bqk"}> : () -> ()
    %cst_47 = arith.constant dense<0.000000e+00> : vector<4x8x8xf32>
    %108 = tpu.matmul %103, %105, %cst_47 {dimension_numbers = #tpu.dot_dimension_numbers<[2], [2], [1], [1], [0, 0, 0, 1, 1, 1], [0], [0]>} : vector<4x8x8xbf16>, vector<4x8x8xbf16>, vector<4x8x8xf32> -> vector<4x8x8xf32>
    %cst_48 = arith.constant -1.76776698E+19 : f32
    "tpu.trace_stop"() : () -> ()
    %109 = vector.shape_cast %8 : vector<4x1x8xi1> to vector<4x1x8xi1>
    %110 = vector.broadcast %109 : vector<4x1x8xi1> to vector<4x8x8xi1>
    %111 = vector.broadcast %cst_48 : f32 to vector<4x8x8xf32>
    %112 = arith.select %110, %108, %111 : vector<4x8x8xi1>, vector<4x8x8xf32>
    %cst_49 = arith.constant dense<0xFF800000> : vector<4x8xf32>
    %113 = vector.multi_reduction <maximumf>, %112, %cst_49 [2] : vector<4x8x8xf32> to vector<4x8xf32>
    %114 = vector.shape_cast %113 : vector<4x8xf32> to vector<4x8x1xf32>
    %115 = vector.broadcast %114 : vector<4x8x1xf32> to vector<4x8x8xf32>
    %116 = arith.subf %112, %115 : vector<4x8x8xf32>
    %117 = math.exp %116 : vector<4x8x8xf32>
    %cst_50 = arith.constant dense<0.000000e+00> : vector<4x8xf32>
    %118 = vector.multi_reduction <add>, %117, %cst_50 [2] : vector<4x8x8xf32> to vector<4x8xf32>
    %119 = vector.shape_cast %118 : vector<4x8xf32> to vector<4x8x1xf32>
    %120 = tpu.reciprocal %119 {approx = true} : vector<4x8x1xf32> -> vector<4x8x1xf32>
    %121 = vector.broadcast %120 : vector<4x8x1xf32> to vector<4x8x8xf32>
    %122 = arith.mulf %117, %121 : vector<4x8x8xf32>
    %c0_51 = arith.constant 0 : index
    %c3 = arith.constant 3 : index
    %c0_52 = arith.constant 0 : index
    %c0_53 = arith.constant 0 : index
    %123 = vector.load %arg11[%c0_51, %c3, %c0_52, %c0_53] : memref<4x4x8x8xf32, #tpu.memory_space<vmem>>, vector<4x1x8x8xf32>
    %124 = vector.shape_cast %123 : vector<4x1x8x8xf32> to vector<4x8x8xf32>
    %125 = vector.shape_cast %122 : vector<4x8x8xf32> to vector<4x1x8x8xf32>
    tpu.vector_store %arg11[%c0_51, %c3, %c0_52, %c0_53], %125 {strides = array<i32>} : memref<4x4x8x8xf32, #tpu.memory_space<vmem>>, vector<4x1x8x8xf32>,
    %126 = arith.truncf %122 : vector<4x8x8xf32> to vector<4x8x8xbf16>
    "tpu.trace_start"() <{level = 10 : i32, message = "bqk,bkd->bqd"}> : () -> ()
    %cst_54 = arith.constant dense<0.000000e+00> : vector<4x8x8xf32>
    %127 = tpu.matmul %126, %107, %cst_54 {dimension_numbers = #tpu.dot_dimension_numbers<[2], [1], [1], [2], [0, 0, 0, 1, 1, 2], [0], [0]>} : vector<4x8x8xbf16>, vector<4x8x8xbf16>, vector<4x8x8xf32> -> vector<4x8x8xf32>
    "tpu.trace_stop"() : () -> ()
    %128 = tpu.concatenate %49, %75, %101, %127 in 2 : vector<4x8x8xf32>, vector<4x8x8xf32>, vector<4x8x8xf32>, vector<4x8x8xf32> -> vector<4x8x32xf32>
    %129 = arith.truncf %128 : vector<4x8x32xf32> to vector<4x8x32xbf16>
    "tpu.trace_start"() <{level = 10 : i32, message = "bqd,bde->bqe"}> : () -> ()
    %cst_55 = arith.constant dense<0.000000e+00> : vector<4x8x32xf32>
    %130 = tpu.matmul %129, %20, %cst_55 {dimension_numbers = #tpu.dot_dimension_numbers<[2], [1], [1], [2], [0, 0, 0, 1, 1, 2], [0], [0]>} : vector<4x8x32xbf16>, vector<4x32x32xbf16>, vector<4x8x32xf32> -> vector<4x8x32xf32>
    "tpu.trace_stop"() : () -> ()
    %c0_56 = arith.constant 0 : index
    %c0_57 = arith.constant 0 : index
    %131 = vector.load %arg9[%c0_56, %c0_57] : memref<1x32xf32, #tpu.memory_space<vmem>>, vector<1x32xf32>
    %132 = vector.shape_cast %131 : vector<1x32xf32> to vector<1x1x32xf32>
    %133 = vector.broadcast %132 : vector<1x1x32xf32> to vector<4x8x32xf32>
    %134 = arith.addf %130, %133 : vector<4x8x32xf32>
    %c0_58 = arith.constant 0 : index
    %c0_59 = arith.constant 0 : index
    %c0_60 = arith.constant 0 : index
    %135 = vector.load %arg10[%c0_58, %c0_59, %c0_60] : memref<4x8x32xf32, #tpu.memory_space<vmem>>, vector<4x8x32xf32>
    tpu.vector_store %arg10[%c0_58, %c0_59, %c0_60], %134 {strides = array<i32>} : memref<4x8x32xf32, #tpu.memory_space<vmem>>, vector<4x8x32xf32>,
    return
  }
  func.func @transform_0(%arg0: i32) -> (i32, i32, i32) {
    %c0_i32 = arith.constant 0 : i32
    %c0_i32_0 = arith.constant 0 : i32
    %c0_i32_1 = arith.constant 0 : i32
    return %arg0, %c0_i32, %c0_i32_0 : i32, i32, i32
  }
  func.func @transform_1(%arg0: i32) -> (i32, i32, i32) {
    %c0_i32 = arith.constant 0 : i32
    %c0_i32_0 = arith.constant 0 : i32
    %c0_i32_1 = arith.constant 0 : i32
    return %arg0, %c0_i32, %c0_i32_0 : i32, i32, i32
  }
  func.func @transform_2(%arg0: i32) -> (i32, i32, i32) {
    %c0_i32 = arith.constant 0 : i32
    %c0_i32_0 = arith.constant 0 : i32
    %c0_i32_1 = arith.constant 0 : i32
    return %arg0, %c0_i32, %c0_i32_0 : i32, i32, i32
  }
  func.func @transform_3(%arg0: i32) -> (i32, i32, i32) {
    %c0_i32 = arith.constant 0 : i32
    %c0_i32_0 = arith.constant 0 : i32
    %c0_i32_1 = arith.constant 0 : i32
    return %arg0, %c0_i32, %c0_i32_0 : i32, i32, i32
  }
  func.func @transform_4(%arg0: i32) -> (i32, i32) {
    %c0_i32 = arith.constant 0 : i32
    %c0_i32_0 = arith.constant 0 : i32
    %c0_i32_1 = arith.constant 0 : i32
    return %c0_i32, %c0_i32_0 : i32, i32
  }
  func.func @transform_5(%arg0: i32) -> (i32, i32) {
    %c0_i32 = arith.constant 0 : i32
    %c0_i32_0 = arith.constant 0 : i32
    %c0_i32_1 = arith.constant 0 : i32
    return %c0_i32, %c0_i32_0 : i32, i32
  }
  func.func @transform_6(%arg0: i32) -> (i32, i32) {
    %c0_i32 = arith.constant 0 : i32
    %c0_i32_0 = arith.constant 0 : i32
    %c0_i32_1 = arith.constant 0 : i32
    return %c0_i32, %c0_i32_0 : i32, i32
  }
  func.func @transform_7(%arg0: i32) -> (i32, i32) {
    %c0_i32 = arith.constant 0 : i32
    %c0_i32_0 = arith.constant 0 : i32
    %c0_i32_1 = arith.constant 0 : i32
    return %c0_i32, %c0_i32_0 : i32, i32
  }
  func.func @transform_8(%arg0: i32) -> (i32, i32) {
    %c0_i32 = arith.constant 0 : i32
    %c0_i32_0 = arith.constant 0 : i32
    %c0_i32_1 = arith.constant 0 : i32
    return %c0_i32, %c0_i32_0 : i32, i32
  }
  func.func @transform_9(%arg0: i32) -> (i32, i32, i32) {
    %c0_i32 = arith.constant 0 : i32
    %c0_i32_0 = arith.constant 0 : i32
    %c0_i32_1 = arith.constant 0 : i32
    return %arg0, %c0_i32, %c0_i32_0 : i32, i32, i32
  }
  func.func @transform_10(%arg0: i32) -> (i32, i32, i32, i32) {
    %c0_i32 = arith.constant 0 : i32
    %c0_i32_0 = arith.constant 0 : i32
    %c0_i32_1 = arith.constant 0 : i32
    %c0_i32_2 = arith.constant 0 : i32
    return %arg0, %c0_i32, %c0_i32_0, %c0_i32_1 : i32, i32, i32, i32
  }
}

</mosaic_0001>

<bundles_post_ra>
// kernel: mha_forward.1
= control target key start
LH: loop header
LB: loop body
LE: loop exit
PB: predicated region body
PF: predicated region fallthrough
CT: control target
= control target key end

     0   :  { %16 = vsyncpa [#allocation3], 0  ;;  %s4285_s0 = inlined_call_operand.hbm [shape: f32[4,8,32], index: 0, kind: input, shape index: {}]   ;;  %s4286_s1 = inlined_call_operand.hbm [shape: f32[4,8,32], index: 1, kind: input, shape index: {}]   ;;  %s4287_s2 = inlined_call_operand.hbm [shape: f32[4,8,32], index: 2, kind: input, shape index: {}]   ;;  %s4288_s3 = inlined_call_operand.vmem [shape: f32[4,1,8], index: 3, kind: input, shape index: {}]   ;;  %s4289_s4 = inlined_call_operand.vmem [shape: bf16[32,32], index: 4, kind: input, shape index: {}]   ;;  %s4290_s5 = inlined_call_operand.hbm [shape: bf16[32,32], index: 5, kind: input, shape index: {}]   ;;  %s4291_s6 = inlined_call_operand.hbm [shape: bf16[32,32], index: 6, kind: input, shape index: {}]   ;;  %s4292_s7 = inlined_call_operand.hbm [shape: bf16[32,32], index: 7, kind: input, shape index: {}]   ;;  %s4293_s8 = inlined_call_operand.vmem [shape: f32[1,32], index: 8, kind: input, shape index: {}]   ;;  %s4294_s9 = inlined_call_operand.hbm [shape: f32[4,8,32], index: 9, kind: output, shape index: {0}]   ;;  %s4295_s10 = inlined_call_operand.hbm [shape: f32[4,4,8,8], index: 10, kind: output, shape index: {1}]  }
   0x1   :  { %17 = vsyncpa [#allocation6], 0 }
   0x2   :  { %18 = vsyncpa [#allocation9], 0 }
   0x3   :  { %19 = vsyncpa [#allocation12], 0 }
   0x4   :  { %20 = vsyncpa [#allocation4], 0 }
   0x5   :  { %21 = vsyncpa [#allocation15], 0  ;;  %s3621_s13 = smov [#allocation5]   ;;  %s3622_s15 = smov [#allocation8]  }
   0x6   :  { %s39_s14 = sshll.u32 %s3621_s13, 4  ;;  %s67_s16 = sshll.u32 %s3622_s15, 4  ;;  %s40_s14 = int_to_ptr.vmem [resolvable:$true] %s39_s14  ;;  %s68_s16 = int_to_ptr.vmem [resolvable:$true] %s67_s16 }
   0x7   :  { %s3457_s17 = scalar_lea.vmem %s40_s14, 512  ;;  %p3462_p1 = scmp.lt.s32.totalorder %s40_s14, %s40_s14 }
   0x8   :  { %p3458_p0 = scmp.ne.s32.totalorder %s40_s14, %s3457_s17  ;;  %p3463_p2 = scmp.lt.s32.totalorder %s3457_s17, %s3457_s17 }
   0xa   :  { %p3464_p3 = por %p3463_p2, %p3462_p1 }
   0xc   :  { %p3465_p4 = pnand %p3464_p3, %p3458_p0 }
   0xe   :  { %3468 = shalt.err (!%p3465_p4)
}
   0xf   :  { %s3623_s18 = smov 128   ;;  %s3624_s19 = smov 8  }
  0x10   :  { %45 = dma.hbm_to_vmem [thread:$0]  %s4286_s1, 512, %s40_s14, [#allocation6], %s3623_s18, %s3623_s18, %s3624_s19  }
  0x11   :  { %s3477_s22 = scalar_lea.vmem %s68_s16, 256  ;;  %p3482_p6 = scmp.lt.s32.totalorder %s68_s16, %s68_s16 }
  0x12   :  { %p3478_p5 = scmp.ne.s32.totalorder %s68_s16, %s3477_s22  ;;  %p3483_p7 = scmp.lt.s32.totalorder %s3477_s22, %s3477_s22 }
  0x14   :  { %p3484_p8 = por %p3483_p7, %p3482_p6 }
  0x16   :  { %p3485_p9 = pnand %p3484_p8, %p3478_p5 }
  0x18   :  { %3488 = shalt.err (!%p3485_p9)
}
  0x19   :  { %s3625_s23 = smov 64   ;;  %s3626_s24 = smov 4  }
  0x1a   :  { %73 = dma.hbm_to_vmem [thread:$0]  %s4290_s5, 256, %s68_s16, [#allocation9], %s3625_s23, %s3625_s23, %s3626_s24  }
  0x1b   :  { %s3627_s27 = smov [#allocation2]   ;;  %s3628_s29 = smov [#allocation7]  }
  0x1c   :  { %s27_s28 = sshll.u32 %s3627_s27, 4  ;;  %s51_s1 = sshll.u32 %s3628_s29, 4  ;;  %s28_s28 = int_to_ptr.vmem [resolvable:$true] %s27_s28  ;;  %s52_s1 = int_to_ptr.vmem [resolvable:$true] %s51_s1 }
  0x1d   :  { %s3497_s30 = scalar_lea.vmem %s28_s28, 512  ;;  %p3502_p11 = scmp.lt.s32.totalorder %s28_s28, %s28_s28 }
  0x1e   :  { %p3498_p10 = scmp.ne.s32.totalorder %s28_s28, %s3497_s30  ;;  %p3503_p12 = scmp.lt.s32.totalorder %s3497_s30, %s3497_s30 }
  0x20   :  { %p3504_p13 = por %p3503_p12, %p3502_p11 }
  0x22   :  { %p3505_p0 = pnand %p3504_p13, %p3498_p10 }
  0x24   :  { %3508 = shalt.err (!%p3505_p0)
}
  0x25   :  { %33 = dma.hbm_to_vmem [thread:$0]  %s4285_s0, 512, %s28_s28, [#allocation3], %s3623_s18, %s3623_s18, %s3624_s19  }
  0x26   :  { %s3517_s5 = scalar_lea.vmem %s52_s1, 512  ;;  %p3522_p2 = scmp.lt.s32.totalorder %s52_s1, %s52_s1 }
  0x27   :  { %p3518_p1 = scmp.ne.s32.totalorder %s52_s1, %s3517_s5  ;;  %p3523_p3 = scmp.lt.s32.totalorder %s3517_s5, %s3517_s5 }
  0x29   :  { %p3524_p4 = por %p3523_p3, %p3522_p2 }
  0x2b   :  { %p3525_p5 = pnand %p3524_p4, %p3518_p1 }
  0x2d   :  { %3528 = shalt.err (!%p3525_p5)
}
  0x2e   :  { %57 = dma.hbm_to_vmem [thread:$0]  %s4287_s2, 512, %s52_s1, [#allocation6], %s3623_s18, %s3623_s18, %s3624_s19  }
  0x2f   :  { %s3629_s15 = smov [#allocation10]   ;;  %s3630_s17 = smov [#allocation11]  }
  0x30   :  { %s79_s16 = sshll.u32 %s3629_s15, 4  ;;  %s91_s20 = sshll.u32 %s3630_s17, 4  ;;  %s80_s16 = int_to_ptr.vmem [resolvable:$true] %s79_s16  ;;  %s92_s20 = int_to_ptr.vmem [resolvable:$true] %s91_s20 }
  0x31   :  { %s3537_s0 = scalar_lea.vmem %s80_s16, 256  ;;  %p3542_p7 = scmp.lt.s32.totalorder %s80_s16, %s80_s16 }
  0x32   :  { %p3538_p6 = scmp.ne.s32.totalorder %s80_s16, %s3537_s0  ;;  %p3543_p8 = scmp.lt.s32.totalorder %s3537_s0, %s3537_s0 }
  0x34   :  { %p3544_p9 = por %p3543_p8, %p3542_p7 }
  0x36   :  { %p3545_p10 = pnand %p3544_p9, %p3538_p6 }
  0x38   :  { %3548 = shalt.err (!%p3545_p10)
}
  0x39   :  { %85 = dma.hbm_to_vmem [thread:$0]  %s4291_s6, 256, %s80_s16, [#allocation9], %s3625_s23, %s3625_s23, %s3626_s24  }
  0x3a   :  { %s3557_s2 = scalar_lea.vmem %s92_s20, 256  ;;  %p3562_p12 = scmp.lt.s32.totalorder %s92_s20, %s92_s20 }
  0x3b   :  { %p3558_p11 = scmp.ne.s32.totalorder %s92_s20, %s3557_s2  ;;  %p3563_p13 = scmp.lt.s32.totalorder %s3557_s2, %s3557_s2 }
  0x3d   :  { %p3564_p0 = por %p3563_p13, %p3562_p12 }
  0x3f   :  { %p3565_p1 = pnand %p3564_p0, %p3558_p11 }
  0x41   :  { %3568 = shalt.err (!%p3565_p1)
}
  0x42   :  { %97 = dma.hbm_to_vmem [thread:$0]  %s4292_s7, 256, %s92_s20, [#allocation12], %s3625_s23, %s3625_s23, %s3626_s24  }
  0x43   :  { %3609 = dma.done.wait [#allocation3], 512  }
  0x44   :  { %3610 = vsyncadd [#allocation3], 4294966784 }
  0x45   :  { %3611 = dma.done.wait [#allocation6], 1024  }
  0x46   :  { %3612 = vsyncadd [#allocation6], 4294966272 }
  0x47   :  { %3613 = dma.done.wait [#allocation9], 512  }
  0x48   :  { %3614 = vsyncadd [#allocation9], 4294966784 }
  0x49   :  { %3615 = dma.done.wait [#allocation12], 256  }
  0x4a   :  { %3616 = vsyncadd [#allocation12], 4294967040  ;;  %v3631_v0 = vmov 0.0   ;;  %vm3632_vm0 = vmmov 0   ;;  %v3377_v1 = vld [vmem:[%s4289_s4 + $0x8] sm:$0xff]   ;;  %v3378_v2 = vld [vmem:[%s4289_s4] sm:$0xff]  }
  0x4b   :  { %3007 = vmatprep.subr.bf16.mxu0 %v3631_v0  ;;  %3015 = vmatprep.subr.bf16.mxu1 %v3631_v0  ;;  %v119_v3 = vld [vmem:[#allocation2] sm:$0xff]  ;;  %v120_v4 = vld [vmem:[#allocation2 + $0x8] sm:$0xff]  ;;  %vm179_vm1 = vcmask 261120   ;;  %v121_v7 = vld [vmem:[#allocation2 + $0x10] sm:$0xff]  ;;  %vm732_vm2 = vcmask 64512   ;;  %vm1000_vm3 = vcmask 1043456  }
  0x4c   :  { %3011 = vmatprep.mubr.msk.bf16.mxu0 %vm3632_vm0, %v3631_v0  ;;  %3019 = vmatprep.mubr.msk.bf16.mxu1 %vm3632_vm0, %v3631_v0  ;;  %v123_v5 = vpack.c.bf16 %v119_v3, %v119_v3  ;;  %v124_v6 = vpack.c.bf16 %v120_v4, %v120_v4  ;;  %v122_v8 = vld [vmem:[#allocation2 + $0x18] sm:$0xff]  ;;  %v125_v9 = vpack.c.bf16 %v121_v7, %v121_v7  ;;  %v3379_v11 = vld [vmem:[#allocation8 + $0x8] sm:$0xff]   ;;  %v3380_v12 = vld [vmem:[#allocation8] sm:$0xff]   ;;  %s3635_s5 = smov 112   ;;  %s3636_s13 = smov 104   ;;  %vm2593_vm12 = vcmask 130048  }
  0x4d   :  { %3008 = vmatpush3.bf16.msra.mxu0 %v3377_v1  ;;  %3016 = vmatpush3.bf16.msra.mxu1 %v3377_v1  ;;  %v126_v10 = vpack.c.bf16 %v122_v8, %v122_v8  ;;  %v127_v13 = vld [vmem:[#allocation5] sm:$0xff]  ;;  %v128_v14 = vld [vmem:[#allocation5 + $0x8] sm:$0xff]  ;;  %v129_v17 = vld [vmem:[#allocation5 + $0x10] sm:$0xff]  ;;  %s3637_s14 = smov 16   ;;  %s3638_s15 = smov 24   ;;  %vm2598_vm13 = vcmask 195584  }
  0x4e   :  { %3009 = vmatprep.subr.bf16.mxu0 %v3631_v0  ;;  %3017 = vmatprep.subr.bf16.mxu1 %v3631_v0  ;;  %v131_v15 = vpack.c.bf16 %v127_v13, %v127_v13  ;;  %v132_v16 = vpack.c.bf16 %v128_v14, %v128_v14  ;;  %v130_v18 = vld [vmem:[#allocation5 + $0x18] sm:$0xff]  ;;  %v133_v19 = vpack.c.bf16 %v129_v17, %v129_v17  ;;  %v3382_v22 = vld [vmem:[#allocation10] sm:$0xff]   ;;  %v135_v23 = vld [vmem:[#allocation7] sm:$0xff]  ;;  %s3639_s16 = smov [#allocation14]  }
  0x4f   :  { %v134_v20 = vpack.c.bf16 %v130_v18, %v130_v18  ;;  %v3381_v21 = vld [vmem:[#allocation10 + $0x8] sm:$0xff]   ;;  %v139_v24 = vpack.c.bf16 %v135_v23, %v135_v23  ;;  %v136_v25 = vld [vmem:[#allocation7 + $0x8] sm:$0xff]  ;;  %v137_v27 = vld [vmem:[#allocation7 + $0x10] sm:$0xff]  ;;  %s2819_s17 = sshll.u32 %s3639_s16, 4  ;;  %s2820_s17 = int_to_ptr.vmem [resolvable:$true] %s2819_s17 }
  0x50   :  { %v140_v26 = vpack.c.bf16 %v136_v25, %v136_v25  ;;  %v141_v28 = vpack.c.bf16 %v137_v27, %v137_v27  ;;  %v138_v29 = vld [vmem:[#allocation7 + $0x18] sm:$0xff]  ;;  %s3569_s20 = scalar_lea.vmem %s2820_s17, 2048  ;;  %p3574_p3 = scmp.lt.s32.totalorder %s2820_s17, %s2820_s17 }
  0x51   :  { %3010 = vmatpush3.bf16.msra.mxu0 %v3378_v2  ;;  %3018 = vmatpush3.bf16.msra.mxu1 %v3378_v2  ;;  %v142_v30 = vpack.c.bf16 %v138_v29, %v138_v29  ;;  %p3570_p2 = scmp.ne.s32.totalorder %s2820_s17, %s3569_s20  ;;  %p3575_p4 = scmp.lt.s32.totalorder %s3569_s20, %s3569_s20 }
  0x52   :  { %3023 = vmatprep.subr.bf16.mxu0 %v3631_v0  ;;  %3031 = vmatprep.subr.bf16.mxu1 %v3631_v0 }
  0x53   :  { %p3576_p5 = por %p3575_p4, %p3574_p3 }
  0x54   :  { %3012 = vmatmul.mubr.msk.bf16.vlgmr.msra.gmra.mxu0 %vm179_vm1, %v123_v5  ;;  %3020 = vmatmul.mubr.msk.bf16.vlgmr.msra.gmra.mxu1 %vm179_vm1, %v124_v6 }
  0x55   :  { %3024 = vmatpush3.bf16.msra.mxu0 %v3377_v1  ;;  %3032 = vmatpush3.bf16.msra.mxu1 %v3377_v1  ;;  %p3577_p6 = pnand %p3576_p5, %p3570_p2 }
  0x56   :  { %3025 = vmatprep.subr.bf16.mxu0 %v3631_v0  ;;  %3033 = vmatprep.subr.bf16.mxu1 %v3631_v0 }
  0x57   :  { %3027 = vmatprep.mubr.msk.bf16.mxu0 %vm3632_vm0, %v3631_v0  ;;  %3035 = vmatprep.mubr.msk.bf16.mxu1 %vm3632_vm0, %v3631_v0 }
  0x59   :  { %3026 = vmatpush3.bf16.msra.mxu0 %v3378_v2  ;;  %3034 = vmatpush3.bf16.msra.mxu1 %v3378_v2 }
  0x5a   :  { %3039 = vmatprep.subr.bf16.mxu0 %v3631_v0  ;;  %3047 = vmatprep.subr.bf16.mxu1 %v3631_v0 }
  0x5c   :  { %3028 = vmatmul.mubr.msk.bf16.vlgmr.msra.gmra.mxu0 %vm179_vm1, %v125_v9  ;;  %3036 = vmatmul.mubr.msk.bf16.vlgmr.msra.gmra.mxu1 %vm179_vm1, %v126_v10 }
  0x5d   :  { %3040 = vmatpush3.bf16.msra.mxu0 %v3379_v11  ;;  %3048 = vmatpush3.bf16.msra.mxu1 %v3379_v11 }
  0x5e   :  { %3041 = vmatprep.subr.bf16.mxu0 %v3631_v0  ;;  %3049 = vmatprep.subr.bf16.mxu1 %v3631_v0 }
  0x5f   :  { %3043 = vmatprep.mubr.msk.bf16.mxu0 %vm3632_vm0, %v3631_v0  ;;  %3051 = vmatprep.mubr.msk.bf16.mxu1 %vm3632_vm0, %v3631_v0 }
  0x61   :  { %3042 = vmatpush3.bf16.msra.mxu0 %v3380_v12  ;;  %3050 = vmatpush3.bf16.msra.mxu1 %v3380_v12 }
  0x62   :  { %3055 = vmatprep.subr.bf16.mxu0 %v3631_v0  ;;  %3063 = vmatprep.subr.bf16.mxu1 %v3631_v0 }
  0x64   :  { %3044 = vmatmul.mubr.msk.bf16.vlgmr.msra.gmra.mxu0 %vm179_vm1, %v131_v15  ;;  %3052 = vmatmul.mubr.msk.bf16.vlgmr.msra.gmra.mxu1 %vm179_vm1, %v132_v16 }
  0x65   :  { %3056 = vmatpush3.bf16.msra.mxu0 %v3379_v11  ;;  %3064 = vmatpush3.bf16.msra.mxu1 %v3379_v11 }
  0x66   :  { %3057 = vmatprep.subr.bf16.mxu0 %v3631_v0  ;;  %3065 = vmatprep.subr.bf16.mxu1 %v3631_v0 }
  0x67   :  { %3059 = vmatprep.mubr.msk.bf16.mxu0 %vm3632_vm0, %v3631_v0  ;;  %3067 = vmatprep.mubr.msk.bf16.mxu1 %vm3632_vm0, %v3631_v0 }
  0x69   :  { %3058 = vmatpush3.bf16.msra.mxu0 %v3380_v12  ;;  %3066 = vmatpush3.bf16.msra.mxu1 %v3380_v12 }
  0x6a   :  { %3071 = vmatprep.subr.bf16.mxu0 %v3631_v0  ;;  %3079 = vmatprep.subr.bf16.mxu1 %v3631_v0 }
  0x6c   :  { %3060 = vmatmul.mubr.msk.bf16.vlgmr.msra.gmra.mxu0 %vm179_vm1, %v133_v19  ;;  %3068 = vmatmul.mubr.msk.bf16.vlgmr.msra.gmra.mxu1 %vm179_vm1, %v134_v20 }
  0x6d   :  { %3072 = vmatpush3.bf16.msra.mxu0 %v3381_v21  ;;  %3080 = vmatpush3.bf16.msra.mxu1 %v3381_v21 }
  0x6e   :  { %3073 = vmatprep.subr.bf16.mxu0 %v3631_v0  ;;  %3075 = vmatprep.mubr.msk.bf16.mxu0 %vm3632_vm0, %v3631_v0 }
  0x6f   :  { %3081 = vmatprep.subr.bf16.mxu1 %v3631_v0  ;;  %3083 = vmatprep.mubr.msk.bf16.mxu1 %vm3632_vm0, %v3631_v0 }
  0x71   :  { %3074 = vmatpush3.bf16.msra.mxu0 %v3382_v22  ;;  %3082 = vmatpush3.bf16.msra.mxu1 %v3382_v22 }
  0x72   :  { %3087 = vmatprep.subr.bf16.mxu0 %v3631_v0  ;;  %3095 = vmatprep.subr.bf16.mxu1 %v3631_v0 }
  0x74   :  { %3076 = vmatmul.mubr.msk.bf16.vlgmr.msra.gmra.mxu0 %vm179_vm1, %v139_v24  ;;  %3084 = vmatmul.mubr.msk.bf16.vlgmr.msra.gmra.mxu1 %vm179_vm1, %v140_v26 }
  0x75   :  { %3088 = vmatpush3.bf16.msra.mxu0 %v3381_v21  ;;  %3091 = vmatprep.mubr.msk.bf16.mxu0 %vm3632_vm0, %v3631_v0 }
  0x76   :  { %3089 = vmatprep.subr.bf16.mxu0 %v3631_v0  ;;  %3096 = vmatpush3.bf16.msra.mxu1 %v3381_v21 }
  0x77   :  { %3097 = vmatprep.subr.bf16.mxu1 %v3631_v0  ;;  %3099 = vmatprep.mubr.msk.bf16.mxu1 %vm3632_vm0, %v3631_v0 }
  0x79   :  { %3090 = vmatpush3.bf16.msra.mxu0 %v3382_v22 }
  0x7a   :  { %3103 = vmatprep.subr.bf16.mxu0 %v3631_v0  ;;  %3098 = vmatpush3.bf16.msra.mxu1 %v3382_v22 }
  0x7b   :  { %3109 = vmatprep.subr.bf16.mxu1 %v3631_v0 }
  0x7c   :  { %3092 = vmatmul.mubr.msk.bf16.vlgmr.msra.gmra.mxu0 %vm179_vm1, %v141_v28 }
  0x7d   :  { %3105 = vmatprep.mubr.msk.bf16.mxu0 %vm3632_vm0, %v3631_v0  ;;  %3100 = vmatmul.mubr.msk.bf16.vlgmr.msra.gmra.mxu1 %vm179_vm1, %v142_v30 }
  0x7e   :  { %3111 = vmatprep.mubr.msk.bf16.mxu1 %vm3632_vm0, %v3631_v0 }
 0x114   :  { %v217_v31 = vpop.f32.mrf.mxu0  ;;  %v260_v32 = vpop.f32.mrf.mxu1 }
 0x115   :  { %v3814_v61 = vpack.c.bf16 %v217_v31, %v217_v31  ;;  %v3816_v62 = vpack.c.bf16 %v260_v32, %v260_v32  ;;  %v921_v32 = vlaneseq }
 0x116   :  { %v3013_v33 = vpop.f32.mrf.mxu0  ;;  %v3021_v34 = vpop.f32.mrf.mxu1 }
 0x117   :  { %v143_v33 = vld [vmem:[%s4288_s3] sm:$0x1]  ;;  %v922_v34 = vshrl.u32 %v921_v32, 7 }
 0x118   :  { %v220_v35 = vpop.f32.mrf.mxu0  ;;  %v263_v36 = vpop.f32.mrf.mxu1  ;;  %vm147_vm4 = vcmp.gt.f32.partialorder %v143_v33, 0.5 }
 0x119   :  { %v144_v35 = vld [vmem:[%s4288_s3 + $0x1] sm:$0x1]  ;;  %v923_v36 = vsub.s32 0, %v922_v34 }
 0x11a   :  { %v3014_v37 = vpop.f32.mrf.mxu0  ;;  %v3022_v38 = vpop.f32.mrf.mxu1  ;;  %vm148_vm5 = vcmp.gt.f32.partialorder %v144_v35, 0.5 }
 0x11b   :  { %v3633_v37 = vmov 0  }
 0x11c   :  { %v303_v39 = vpop.f32.mrf.mxu0  ;;  %v346_v40 = vpop.f32.mrf.mxu1  ;;  %v917_v38 = vsel %vm147_vm4, 1, %v3633_v37 }
 0x11d   :  { %v3836_v10 = vpack.c.bf16 %v303_v39, %v303_v39  ;;  %v3838_v11 = vpack.c.bf16 %v346_v40, %v346_v40  ;;  %v918_v39 = vsel %vm148_vm5, 1, %v3633_v37  ;;  %v145_v40 = vld [vmem:[%s4288_s3 + $0x2] sm:$0x1] }
 0x11e   :  { %v3029_v41 = vpop.f32.mrf.mxu0  ;;  %v3037_v42 = vpop.f32.mrf.mxu1  ;;  %vm149_vm6 = vcmp.gt.f32.partialorder %v145_v40, 0.5 }
 0x11f   :  { %v924_v41 = vrot.slane %v917_v38, %v923_v36  ;;  %v146_v42 = vld [vmem:[%s4288_s3 + $0x3] sm:$0x1]  ;;  %s3634_s3 = smov 120  }
 0x120   :  { %v306_v43 = vpop.f32.mrf.mxu0  ;;  %v349_v44 = vpop.f32.mrf.mxu1  ;;  %vm150_vm8 = vcmp.gt.f32.partialorder %v146_v42, 0.5 }
 0x121   :  { %v928_v43 = vrot.slane %v918_v39, %v923_v36  ;;  %vm3874_vm7 = vcmp.eq.s32.totalorder %v924_v41, 1 }
 0x122   :  { %v3030_v45 = vpop.f32.mrf.mxu0  ;;  %v3038_v46 = vpop.f32.mrf.mxu1 }
 0x123   :  { %v919_v45 = vsel %vm149_vm6, 1, %v3633_v37  ;;  %vm3878_vm9 = vcmp.eq.s32.totalorder %v928_v43, 1 }
 0x124   :  { %v401_v47 = vpop.f32.mrf.mxu0  ;;  %v444_v48 = vpop.f32.mrf.mxu1 }
 0x125   :  { %v3804_v49 = vpack.c.bf16 %v401_v47, %v401_v47  ;;  %v3806_v50 = vpack.c.bf16 %v444_v48, %v444_v48 }
 0x126   :  { %v3045_v51 = vpop.f32.mrf.mxu0  ;;  %v3053_v52 = vpop.f32.mrf.mxu1 }
 0x127   :  { %v737_v53 = vsel %vm732_vm2, %v3804_v49, 0  ;;  %v783_v54 = vsel %vm732_vm2, %v3806_v50, 0  ;;  %v920_v52 = vsel %vm150_vm8, 1, %v3633_v37 }
 0x128   :  { %v404_v55 = vpop.f32.mrf.mxu0  ;;  %v447_v56 = vpop.f32.mrf.mxu1  ;;  %3104 = vmatpush3.bf16.xpose.msra.mxu0 %v737_v53  ;;  %3110 = vmatpush3.bf16.xpose.msra.mxu1 %v783_v54 }
 0x129   :  { %3115 = vmatprep.subr.bf16.mxu0 %v3631_v0  ;;  %3121 = vmatprep.subr.bf16.mxu1 %v3631_v0  ;;  %v932_v56 = vrot.slane %v919_v45, %v923_v36 }
 0x12a   :  { %v3046_v57 = vpop.f32.mrf.mxu0  ;;  %v3054_v58 = vpop.f32.mrf.mxu1 }
 0x12b   :  { %vm3888_vm10 = vcmp.eq.s32.totalorder %v932_v56, 1 }
 0x12c   :  { %v487_v59 = vpop.f32.mrf.mxu0  ;;  %v530_v60 = vpop.f32.mrf.mxu1 }
 0x12d   :  { %v3818_v63 = vpack.c.bf16 %v487_v59, %v487_v59  ;;  %v3820_v1 = vpack.c.bf16 %v530_v60, %v530_v60  ;;  %v936_v60 = vrot.slane %v920_v52, %v923_v36 }
 0x12e   :  { %v3061_v2 = vpop.f32.mrf.mxu0  ;;  %v3069_v3 = vpop.f32.mrf.mxu1 }
 0x12f   :  { %3106 = vmatmul.mubr.msk.bf16.vlgmr.msra.gmra.mxu0 %vm732_vm2, %v3814_v61  ;;  %3112 = vmatmul.mubr.msk.bf16.vlgmr.msra.gmra.mxu1 %vm732_vm2, %v3816_v62  ;;  %v829_v4 = vsel %vm732_vm2, %v3818_v63, 0  ;;  %v875_v5 = vsel %vm732_vm2, %v3820_v1, 0  ;;  %vm3892_vm11 = vcmp.eq.s32.totalorder %v936_v60, 1 }
 0x130   :  { %3116 = vmatpush3.bf16.xpose.msra.mxu0 %v829_v4  ;;  %3122 = vmatpush3.bf16.xpose.msra.mxu1 %v875_v5  ;;  %v490_v6 = vpop.f32.mrf.mxu0  ;;  %v533_v7 = vpop.f32.mrf.mxu1 }
 0x131   :  { %3117 = vmatprep.mubr.msk.bf16.mxu0 %vm3632_vm0, %v3631_v0  ;;  %3123 = vmatprep.mubr.msk.bf16.mxu1 %vm3632_vm0, %v3631_v0 }
 0x132   :  { %v3062_v8 = vpop.f32.mrf.mxu0  ;;  %v3070_v9 = vpop.f32.mrf.mxu1  ;;  %3127 = vmatprep.subr.bf16.mxu0 %v3631_v0  ;;  %3133 = vmatprep.subr.bf16.mxu1 %v3631_v0 }
 0x134   :  { %v585_v12 = vpop.f32.mrf.mxu0  ;;  %v628_v17 = vpop.f32.mrf.mxu1 }
 0x135   :  { %v3848_v13 = vpack.c.bf16 %v585_v12, %v585_v12  ;;  %v3852_v18 = vpack.c.bf16 %v628_v17, %v628_v17 }
 0x136   :  { %v3077_v14 = vpop.f32.mrf.mxu0  ;;  %v3085_v20 = vpop.f32.mrf.mxu1 }
 0x137   :  { %3118 = vmatmul.mubr.msk.bf16.vlgmr.msra.gmra.mxu0 %vm732_vm2, %v3836_v10  ;;  %3124 = vmatmul.mubr.msk.bf16.vlgmr.msra.gmra.mxu1 %vm732_vm2, %v3838_v11  ;;  %v1002_v15 = vsel %vm1000_vm3, %v3848_v13, 0  ;;  %v1048_v21 = vsel %vm1000_vm3, %v3852_v18, 0 }
 0x138   :  { %3129 = vmatprep.mubr.msk.bf16.mxu0 %vm3632_vm0, %v3631_v0  ;;  %3135 = vmatprep.mubr.msk.bf16.mxu1 %vm3632_vm0, %v3631_v0  ;;  %v588_v16 = vpop.f32.mrf.mxu0  ;;  %v631_v22 = vpop.f32.mrf.mxu1 }
 0x139   :  { %3128 = vmatpush3.bf16.msra.mxu0 %v1002_v15  ;;  %3134 = vmatpush3.bf16.msra.mxu1 %v1048_v21 }
 0x13a   :  { %3139 = vmatprep.subr.bf16.mxu0 %v3631_v0  ;;  %v3078_v19 = vpop.f32.mrf.mxu0  ;;  %3145 = vmatprep.subr.bf16.mxu1 %v3631_v0  ;;  %v3086_v24 = vpop.f32.mrf.mxu1 }
 0x13c   :  { %v3857_v23 = vpop.f32.mrf.mxu0 }
 0x13d   :  { %v3860_v27 = vpop.f32.mrf.mxu1 }
 0x13e   :  { %v3093_v25 = vpop.f32.mrf.mxu0 }
 0x13f   :  { %v3101_v29 = vpop.f32.mrf.mxu1 }
 0x140   :  { %v674_v26 = vpop.f32.mrf.mxu0 }
 0x141   :  { %v717_v30 = vpop.f32.mrf.mxu1 }
 0x142   :  { %v3094_v28 = vpop.f32.mrf.mxu0 }
 0x143   :  { %v3102_v31 = vpop.f32.mrf.mxu1 }
 0x1ef   :  { %v773_v46 = vpop.f32.mrf.mxu0  ;;  %v819_v47 = vpop.f32.mrf.mxu1 }
 0x1f0   :  { %v941_v51 = vsel %vm3874_vm7, %v773_v46, -1.767767e+19  ;;  %v942_v57 = vsel %vm3878_vm9, %v819_v47, -1.767767e+19 }
 0x1f1   :  { %v3107_v53 = vpop.f32.mrf.mxu0  ;;  %v3113_v54 = vpop.f32.mrf.mxu1  ;;  %v945_v55 = vsel %vm732_vm2, %v941_v51, -inf  ;;  %v948_v4 = vsel %vm732_vm2, %v942_v57, -inf }
 0x1f2   :  { %946 = vmax.xlane.f32.xlu0 %v945_v55  ;;  %v3924_v53 = vpack.c.bf16 %v3857_v23, %v3857_v23 }
 0x1f3   :  { %v776_v58 = vpop.f32.mrf.mxu0  ;;  %v822_v59 = vpop.f32.mrf.mxu1 }
 0x1f4   :  { %v1094_v58 = vsel %vm1000_vm3, %v3924_v53, 0 }
 0x1f5   :  { %v3108_v2 = vpop.f32.mrf.mxu0  ;;  %v3114_v3 = vpop.f32.mrf.mxu1 }
 0x1f6   :  { %949 = vmax.xlane.f32.xlu0 %v948_v4 }
 0x1f7   :  { %v865_v6 = vpop.f32.mrf.mxu0  ;;  %v911_v7 = vpop.f32.mrf.mxu1 }
 0x1f8   :  { %v943_v9 = vsel %vm3888_vm10, %v865_v6, -1.767767e+19  ;;  %v944_v16 = vsel %vm3892_vm11, %v911_v7, -1.767767e+19 }
 0x1f9   :  { %v3119_v12 = vpop.f32.mrf.mxu0  ;;  %v3125_v14 = vpop.f32.mrf.mxu1  ;;  %v951_v15 = vsel %vm732_vm2, %v943_v9, -inf  ;;  %v954_v22 = vsel %vm732_vm2, %v944_v16, -inf }
 0x1fa   :  { %952 = vmax.xlane.f32.xlu1 %v951_v15 }
 0x1fb   :  { %v868_v17 = vpop.f32.mrf.mxu0  ;;  %v914_v19 = vpop.f32.mrf.mxu1 }
 0x1fd   :  { %v3120_v20 = vpop.f32.mrf.mxu0  ;;  %v3126_v21 = vpop.f32.mrf.mxu1 }
 0x1fe   :  { %955 = vmax.xlane.f32.xlu1 %v954_v22 }
 0x27b   :  { %v947_v24 = vpop.xlane.xlu0 %946 }
 0x27c   :  { %v957_v25 = vsub.f32 %v941_v51, %v947_v24 }
 0x27e   :  { %v961_v26 = vmul.f32 1.442695, %v957_v25 }
 0x27f   :  { %v950_v28 = vpop.xlane.xlu0 %949 }
 0x280   :  { %3385 = vpow2.f32 %v961_v26  ;;  %v958_v29 = vsub.f32 %v942_v57, %v950_v28  ;;  %v3929_v57 = vpack.c.bf16 %v3860_v27, %v3860_v27 }
 0x282   :  { %v963_v30 = vmul.f32 1.442695, %v958_v29  ;;  %v1140_v27 = vsel %vm1000_vm3, %v3929_v57, 0 }
 0x283   :  { %v953_v31 = vpop.xlane.xlu1 %952 }
 0x284   :  { %3387 = vpow2.f32 %v963_v30  ;;  %v959_v32 = vsub.f32 %v943_v9, %v953_v31 }
 0x286   :  { %v965_v33 = vmul.f32 1.442695, %v959_v32 }
 0x287   :  { %v956_v40 = vpop.xlane.xlu1 %955 }
 0x288   :  { %3389 = vpow2.f32 %v965_v33  ;;  %v960_v41 = vsub.f32 %v944_v16, %v956_v40 }
 0x28a   :  { %v967_v42 = vmul.f32 1.442695, %v960_v41 }
 0x28c   :  { %3391 = vpow2.f32 %v967_v42 }
 0x28d   :  { %v3386_v34 = vpop.eup %3385 }
 0x28e   :  { %v969_v35 = vsel %vm732_vm2, %v3386_v34, 0.0 }
 0x28f   :  { %970 = vadd.xlane.f32.xlu0 %v969_v35 }
 0x291   :  { %v3388_v36 = vpop.eup %3387 }
 0x292   :  { %v972_v37 = vsel %vm732_vm2, %v3388_v36, 0.0 }
 0x293   :  { %973 = vadd.xlane.f32.xlu1 %v972_v37 }
 0x295   :  { %v3390_v38 = vpop.eup %3389 }
 0x296   :  { %v975_v39 = vsel %vm732_vm2, %v3390_v38, 0.0 }
 0x297   :  { %976 = vadd.xlane.f32.xlu0 %v975_v39 }
 0x299   :  { %v3392_v43 = vpop.eup %3391 }
 0x29a   :  { %v978_v45 = vsel %vm732_vm2, %v3392_v43, 0.0 }
 0x2a4   :  { %1238 = vrot.lane.b32.xlu1 %v3806_v50, %s3634_s3 }
 0x2a8   :  { %1183 = vrot.lane.b32.xlu1 %v3814_v61, %s3634_s3 }
 0x2ad   :  { %1186 = vrot.lane.b32.xlu0 %v3804_v49, %s3634_s3 }
 0x2b1   :  { %1290 = vrot.lane.b32.xlu0 %v3818_v63, %s3634_s3 }
 0x2b5   :  { %1287 = vrot.lane.b32.xlu0 %v3836_v10, %s3634_s3 }
 0x2cc   :  { %979 = vadd.xlane.f32.xlu1 %v978_v45 }
 0x2dd   :  { %1235 = vrot.lane.b32.xlu1 %v3816_v62, %s3634_s3 }
 0x2e1   :  { %1342 = vrot.lane.b32.xlu1 %v3820_v1, %s3634_s3 }
 0x2e5   :  { %1339 = vrot.lane.b32.xlu1 %v3838_v11, %s3634_s3 }
 0x318   :  { %v971_v46 = vpop.xlane.xlu0 %970 }
 0x319   :  { %3393 = vrcp.f32 %v971_v46 }
 0x31c   :  { %v974_v47 = vpop.xlane.xlu1 %973 }
 0x31d   :  { %3395 = vrcp.f32 %v974_v47 }
 0x320   :  { %v977_v51 = vpop.xlane.xlu0 %976  ;;  %v1239_v7 = vpop.permute.xlu1 %1238 }
 0x321   :  { %3397 = vrcp.f32 %v977_v51  ;;  %v1244_v22 = vsel %vm732_vm2, %v1239_v7, 0 }
 0x324   :  { %v1187_v3 = vpop.permute.xlu0 %1186  ;;  %v1184_v12 = vpop.permute.xlu1 %1183 }
 0x325   :  { %v1192_v6 = vsel %vm732_vm2, %v1187_v3, 0 }
 0x326   :  { %v3394_v52 = vpop.eup %3393 }
 0x327   :  { %v985_v54 = vmul.f32 %v3394_v52, %v3386_v34 }
 0x328   :  { %v1291_v9 = vpop.permute.xlu0 %1290 }
 0x329   :  { %989 = vst.msk [vmem:[#allocation14] sm:$0xff] %vm732_vm2, %v985_v54  ;;  %v993_v55 = vpack.c.bf16 %v985_v54, %v985_v54  ;;  %v1296_v14 = vsel %vm732_vm2, %v1291_v9, 0 }
 0x32a   :  { %v3396_v56 = vpop.eup %3395 }
 0x32b   :  { %3130 = vmatmul.mubr.msk.bf16.vlgmr.msra.gmra.mxu0 %vm732_vm2, %v993_v55  ;;  %v986_v59 = vmul.f32 %v3396_v56, %v3388_v36 }
 0x32c   :  { %3140 = vmatpush3.bf16.msra.mxu0 %v1094_v58  ;;  %3141 = vmatprep.mubr.msk.bf16.mxu0 %vm3632_vm0, %v3631_v0  ;;  %v1288_v15 = vpop.permute.xlu0 %1287 }
 0x32d   :  { %990 = vst.msk [vmem:[#allocation14 + $0x20] sm:$0xff] %vm732_vm2, %v986_v59  ;;  %v994_v23 = vpack.c.bf16 %v986_v59, %v986_v59  ;;  %3151 = vmatprep.subr.bf16.mxu0 %v3631_v0 }
 0x32e   :  { %v3398_v60 = vpop.eup %3397 }
 0x32f   :  { %3136 = vmatmul.mubr.msk.bf16.vlgmr.msra.gmra.mxu1 %vm732_vm2, %v994_v23  ;;  %v987_v2 = vmul.f32 %v3398_v60, %v3390_v38 }
 0x330   :  { %3146 = vmatpush3.bf16.msra.mxu1 %v1140_v27  ;;  %3147 = vmatprep.mubr.msk.bf16.mxu1 %vm3632_vm0, %v3631_v0 }
 0x331   :  { %991 = vst.msk [vmem:[#allocation14 + $0x40] sm:$0xff] %vm732_vm2, %v987_v2  ;;  %v995_v4 = vpack.c.bf16 %v987_v2, %v987_v2  ;;  %3157 = vmatprep.subr.bf16.mxu1 %v3631_v0 }
 0x333   :  { %3142 = vmatmul.mubr.msk.bf16.vlgmr.msra.gmra.mxu0 %vm732_vm2, %v995_v4 }
 0x334   :  { %3152 = vmatpush3.bf16.xpose.msra.mxu0 %v1192_v6  ;;  %3153 = vmatprep.mubr.msk.bf16.mxu0 %vm3632_vm0, %v3631_v0 }
 0x335   :  { %3163 = vmatprep.subr.bf16.mxu0 %v3631_v0 }
 0x33b   :  { %3154 = vmatmul.mubr.msk.bf16.vlgmr.msra.gmra.mxu0 %vm732_vm2, %v1184_v12 }
 0x33c   :  { %3164 = vmatpush3.bf16.xpose.msra.mxu0 %v1296_v14  ;;  %3165 = vmatprep.mubr.msk.bf16.mxu0 %vm3632_vm0, %v3631_v0 }
 0x33d   :  { %3175 = vmatprep.subr.bf16.mxu0 %v3631_v0 }
 0x343   :  { %3166 = vmatmul.mubr.msk.bf16.vlgmr.msra.gmra.mxu0 %vm732_vm2, %v1288_v15 }
 0x344   :  { %3177 = vmatprep.mubr.msk.bf16.mxu0 %vm3632_vm0, %v3631_v0 }
 0x355   :  { %v980_v16 = vpop.xlane.xlu1 %979 }
 0x356   :  { %3399 = vrcp.f32 %v980_v16 }
 0x359   :  { %v1236_v21 = vpop.permute.xlu1 %1235 }
 0x35d   :  { %v1343_v24 = vpop.permute.xlu1 %1342 }
 0x35e   :  { %v1348_v25 = vsel %vm732_vm2, %v1343_v24, 0 }
 0x361   :  { %v1340_v26 = vpop.permute.xlu1 %1339 }
 0x363   :  { %v3400_v17 = vpop.eup %3399 }
 0x364   :  { %v988_v19 = vmul.f32 %v3400_v17, %v3392_v43 }
 0x366   :  { %992 = vst.msk [vmem:[#allocation14 + $0x60] sm:$0xff] %vm732_vm2, %v988_v19  ;;  %v996_v20 = vpack.c.bf16 %v988_v19, %v988_v19 }
 0x368   :  { %3148 = vmatmul.mubr.msk.bf16.vlgmr.msra.gmra.mxu1 %vm732_vm2, %v996_v20 }
 0x369   :  { %3158 = vmatpush3.bf16.xpose.msra.mxu1 %v1244_v22  ;;  %3159 = vmatprep.mubr.msk.bf16.mxu1 %vm3632_vm0, %v3631_v0 }
 0x36a   :  { %3169 = vmatprep.subr.bf16.mxu1 %v3631_v0 }
 0x370   :  { %3160 = vmatmul.mubr.msk.bf16.vlgmr.msra.gmra.mxu1 %vm732_vm2, %v1236_v21 }
 0x371   :  { %3170 = vmatpush3.bf16.xpose.msra.mxu1 %v1348_v25  ;;  %3171 = vmatprep.mubr.msk.bf16.mxu1 %vm3632_vm0, %v3631_v0 }
 0x372   :  { %3181 = vmatprep.subr.bf16.mxu1 %v3631_v0 }
 0x378   :  { %3172 = vmatmul.mubr.msk.bf16.vlgmr.msra.gmra.mxu1 %vm732_vm2, %v1340_v26 }
 0x379   :  { %3183 = vmatprep.mubr.msk.bf16.mxu1 %vm3632_vm0, %v3631_v0 }
 0x3eb   :  { %v3972_v28 = vpop.f32.mrf.mxu0 }
 0x3ed   :  { %v3131_v29 = vpop.f32.mrf.mxu0 }
 0x3ef   :  { %v1041_v30 = vpop.f32.mrf.mxu0  ;;  %v3974_v31 = vpop.f32.mrf.mxu1 }
 0x3f1   :  { %v3132_v32 = vpop.f32.mrf.mxu0  ;;  %v3137_v33 = vpop.f32.mrf.mxu1 }
 0x3f3   :  { %v1087_v34 = vpop.f32.mrf.mxu1  ;;  %v3976_v35 = vpop.f32.mrf.mxu0 }
 0x3f5   :  { %v3138_v36 = vpop.f32.mrf.mxu1  ;;  %v3143_v37 = vpop.f32.mrf.mxu0 }
 0x3f7   :  { %v1133_v38 = vpop.f32.mrf.mxu0 }
 0x3f9   :  { %v3144_v39 = vpop.f32.mrf.mxu0 }
 0x3fb   :  { %v1228_v40 = vpop.f32.mrf.mxu0 }
 0x3fc   :  { %v1390_v41 = vsel %vm3874_vm7, %v1228_v40, -1.767767e+19 }
 0x3fd   :  { %v3155_v42 = vpop.f32.mrf.mxu0  ;;  %v1394_v43 = vsel %vm732_vm2, %v1390_v41, -inf }
 0x3fe   :  { %1395 = vmax.xlane.f32.xlu0 %v1394_v43 }
 0x3ff   :  { %v1231_v45 = vpop.f32.mrf.mxu0 }
 0x401   :  { %v3156_v46 = vpop.f32.mrf.mxu0 }
 0x403   :  { %v1332_v47 = vpop.f32.mrf.mxu0 }
 0x404   :  { %v1392_v51 = vsel %vm3888_vm10, %v1332_v47, -1.767767e+19 }
 0x405   :  { %v3167_v52 = vpop.f32.mrf.mxu0  ;;  %v1400_v54 = vsel %vm732_vm2, %v1392_v51, -inf }
 0x406   :  { %1401 = vmax.xlane.f32.xlu0 %v1400_v54 }
 0x407   :  { %v1335_v55 = vpop.f32.mrf.mxu0 }
 0x409   :  { %v3168_v56 = vpop.f32.mrf.mxu0 }
 0x428   :  { %v3984_v58 = vpop.f32.mrf.mxu1 }
 0x42a   :  { %v3149_v59 = vpop.f32.mrf.mxu1 }
 0x42c   :  { %v1179_v23 = vpop.f32.mrf.mxu1 }
 0x42e   :  { %v3150_v60 = vpop.f32.mrf.mxu1 }
 0x430   :  { %v1280_v27 = vpop.f32.mrf.mxu1 }
 0x431   :  { %v1391_v2 = vsel %vm3878_vm9, %v1280_v27, -1.767767e+19 }
 0x432   :  { %v3161_v3 = vpop.f32.mrf.mxu1  ;;  %v1397_v4 = vsel %vm732_vm2, %v1391_v2, -inf }
 0x433   :  { %1398 = vmax.xlane.f32.xlu1 %v1397_v4 }
 0x434   :  { %v1283_v6 = vpop.f32.mrf.mxu1 }
 0x436   :  { %v3162_v7 = vpop.f32.mrf.mxu1 }
 0x438   :  { %v1384_v9 = vpop.f32.mrf.mxu1 }
 0x439   :  { %v1393_v12 = vsel %vm3892_vm11, %v1384_v9, -1.767767e+19 }
 0x43a   :  { %v3173_v14 = vpop.f32.mrf.mxu1  ;;  %v1403_v15 = vsel %vm732_vm2, %v1393_v12, -inf }
 0x43b   :  { %1404 = vmax.xlane.f32.xlu0 %v1403_v15 }
 0x43c   :  { %v1387_v16 = vpop.f32.mrf.mxu1 }
 0x43e   :  { %v3174_v17 = vpop.f32.mrf.mxu1 }
 0x444   :  { %1497 = vrot.lane.b32.xlu1 %v3852_v18, %s3634_s3 }
 0x448   :  { %1546 = vrot.lane.b32.xlu1 %v3924_v53, %s3634_s3 }
 0x44c   :  { %1595 = vrot.lane.b32.xlu1 %v3929_v57, %s3634_s3 }
 0x487   :  { %v1396_v19 = vpop.xlane.xlu0 %1395 }
 0x488   :  { %v1406_v20 = vsub.f32 %v1390_v41, %v1396_v19 }
 0x48a   :  { %v1410_v21 = vmul.f32 1.442695, %v1406_v20 }
 0x48c   :  { %3401 = vpow2.f32 %v1410_v21 }
 0x48f   :  { %v1402_v25 = vpop.xlane.xlu0 %1401 }
 0x490   :  { %v1408_v26 = vsub.f32 %v1392_v51, %v1402_v25 }
 0x492   :  { %v1414_v29 = vmul.f32 1.442695, %v1408_v26 }
 0x494   :  { %3403 = vpow2.f32 %v1414_v29 }
 0x499   :  { %v3402_v22 = vpop.eup %3401 }
 0x49a   :  { %v1418_v24 = vsel %vm732_vm2, %v3402_v22, 0.0 }
 0x49b   :  { %1419 = vadd.xlane.f32.xlu0 %v1418_v24 }
 0x4a1   :  { %v3404_v37 = vpop.eup %3403 }
 0x4a2   :  { %v1424_v40 = vsel %vm732_vm2, %v3404_v37, 0.0 }
 0x4b1   :  { %1448 = vrot.lane.b32.xlu0 %v3848_v13, %s3634_s3 }
 0x4bc   :  { %v1399_v30 = vpop.xlane.xlu1 %1398 }
 0x4bd   :  { %v1407_v32 = vsub.f32 %v1391_v2, %v1399_v30 }
 0x4bf   :  { %v1412_v33 = vmul.f32 1.442695, %v1407_v32 }
 0x4c0   :  { %v1498_v34 = vpop.permute.xlu1 %1497 }
 0x4c1   :  { %3405 = vpow2.f32 %v1412_v33  ;;  %v1503_v36 = vsel %vm1000_vm3, %v1498_v34, 0 }
 0x4c2   :  { %3182 = vmatpush3.bf16.msra.mxu1 %v1503_v36 }
 0x4c3   :  { %3193 = vmatprep.subr.bf16.mxu1 %v3631_v0 }
 0x4c4   :  { %v1405_v41 = vpop.xlane.xlu0 %1404  ;;  %v1547_v56 = vpop.permute.xlu1 %1546 }
 0x4c5   :  { %v1409_v42 = vsub.f32 %v1393_v12, %v1405_v41  ;;  %v1552_v23 = vsel %vm1000_vm3, %v1547_v56, 0 }
 0x4c7   :  { %v1416_v43 = vmul.f32 1.442695, %v1409_v42 }
 0x4c8   :  { %v1596_v60 = vpop.permute.xlu1 %1595 }
 0x4c9   :  { %3407 = vpow2.f32 %v1416_v43  ;;  %v1601_v15 = vsel %vm1000_vm3, %v1596_v60, 0 }
 0x4ce   :  { %v3406_v38 = vpop.eup %3405 }
 0x4cf   :  { %v1421_v39 = vsel %vm732_vm2, %v3406_v38, 0.0 }
 0x4d0   :  { %1422 = vadd.xlane.f32.xlu1 %v1421_v39  ;;  %1425 = vadd.xlane.f32.xlu0 %v1424_v40 }
 0x4d6   :  { %v3408_v45 = vpop.eup %3407 }
 0x4d7   :  { %v1427_v46 = vsel %vm732_vm2, %v3408_v45, 0.0 }
 0x4e1   :  { %1695 = vrot.lane.b32.xlu1 %v3806_v50, %s3635_s5 }
 0x4e6   :  { %1645 = vrot.lane.b32.xlu0 %v3804_v49, %s3635_s5 }
 0x4ea   :  { %1643 = vrot.lane.b32.xlu0 %v3814_v61, %s3635_s5 }
 0x4ee   :  { %1745 = vrot.lane.b32.xlu0 %v3818_v63, %s3635_s5 }
 0x4f2   :  { %1743 = vrot.lane.b32.xlu0 %v3836_v10, %s3635_s5 }
 0x505   :  { %1428 = vadd.xlane.f32.xlu1 %v1427_v46 }
 0x516   :  { %1693 = vrot.lane.b32.xlu1 %v3816_v62, %s3635_s5 }
 0x51a   :  { %1795 = vrot.lane.b32.xlu1 %v3820_v1, %s3635_s5 }
 0x51e   :  { %1793 = vrot.lane.b32.xlu1 %v3838_v11, %s3635_s5 }
 0x524   :  { %v1420_v47 = vpop.xlane.xlu0 %1419 }
 0x525   :  { %3409 = vrcp.f32 %v1420_v47 }
 0x528   :  { %v1449_v51 = vpop.permute.xlu0 %1448 }
 0x529   :  { %v1454_v52 = vsel %vm1000_vm3, %v1449_v51, 0 }
 0x52a   :  { %3176 = vmatpush3.bf16.msra.mxu0 %v1454_v52 }
 0x52b   :  { %3187 = vmatprep.subr.bf16.mxu0 %v3631_v0 }
 0x532   :  { %v3410_v54 = vpop.eup %3409 }
 0x533   :  { %v1434_v55 = vmul.f32 %v3410_v54, %v3402_v22 }
 0x535   :  { %1439 = vst.msk [vmem:[#allocation14 + $0x8] sm:$0xff] %vm732_vm2, %v1434_v55  ;;  %v1443_v59 = vpack.c.bf16 %v1434_v55, %v1434_v55 }
 0x537   :  { %3178 = vmatmul.mubr.msk.bf16.vlgmr.msra.gmra.mxu0 %vm732_vm2, %v1443_v59 }
 0x538   :  { %3188 = vmatpush3.bf16.msra.mxu0 %v1552_v23  ;;  %3189 = vmatprep.mubr.msk.bf16.mxu0 %vm3632_vm0, %v3631_v0 }
 0x539   :  { %3199 = vmatprep.subr.bf16.mxu0 %v3631_v0 }
 0x559   :  { %v1423_v27 = vpop.xlane.xlu1 %1422  ;;  %v1426_v2 = vpop.xlane.xlu0 %1425 }
 0x55a   :  { %3411 = vrcp.f32 %v1423_v27 }
 0x55b   :  { %3413 = vrcp.f32 %v1426_v2 }
 0x55d   :  { %v1646_v3 = vpop.permute.xlu0 %1645  ;;  %v1696_v22 = vpop.permute.xlu1 %1695 }
 0x55e   :  { %v1651_v17 = vsel %vm732_vm2, %v1646_v3, 0  ;;  %v1701_v32 = vsel %vm732_vm2, %v1696_v22, 0 }
 0x561   :  { %v1644_v16 = vpop.permute.xlu0 %1643 }
 0x565   :  { %v1746_v19 = vpop.permute.xlu0 %1745 }
 0x566   :  { %v1751_v20 = vsel %vm732_vm2, %v1746_v19, 0 }
 0x567   :  { %v3412_v4 = vpop.eup %3411 }
 0x568   :  { %v3414_v6 = vpop.eup %3413  ;;  %v1435_v7 = vmul.f32 %v3412_v4, %v3406_v38 }
 0x569   :  { %v1436_v9 = vmul.f32 %v3414_v6, %v3404_v37  ;;  %v1744_v21 = vpop.permute.xlu0 %1743 }
 0x56a   :  { %1440 = vst.msk [vmem:[#allocation14 + $0x28] sm:$0xff] %vm732_vm2, %v1435_v7  ;;  %v1444_v12 = vpack.c.bf16 %v1435_v7, %v1435_v7 }
 0x56b   :  { %1441 = vst.msk [vmem:[#allocation14 + $0x48] sm:$0xff] %vm732_vm2, %v1436_v9  ;;  %v1445_v14 = vpack.c.bf16 %v1436_v9, %v1436_v9 }
 0x56c   :  { %3184 = vmatmul.mubr.msk.bf16.vlgmr.msra.gmra.mxu1 %vm732_vm2, %v1444_v12 }
 0x56d   :  { %3190 = vmatmul.mubr.msk.bf16.vlgmr.msra.gmra.mxu0 %vm732_vm2, %v1445_v14  ;;  %3194 = vmatpush3.bf16.msra.mxu1 %v1601_v15 }
 0x56e   :  { %3200 = vmatpush3.bf16.xpose.msra.mxu0 %v1651_v17  ;;  %3201 = vmatprep.mubr.msk.bf16.mxu0 %vm3632_vm0, %v3631_v0 }
 0x56f   :  { %3211 = vmatprep.subr.bf16.mxu0 %v3631_v0  ;;  %3195 = vmatprep.mubr.msk.bf16.mxu1 %vm3632_vm0, %v3631_v0 }
 0x570   :  { %3205 = vmatprep.subr.bf16.mxu1 %v3631_v0 }
 0x575   :  { %3202 = vmatmul.mubr.msk.bf16.vlgmr.msra.gmra.mxu0 %vm732_vm2, %v1644_v16 }
 0x576   :  { %3212 = vmatpush3.bf16.xpose.msra.mxu0 %v1751_v20  ;;  %3213 = vmatprep.mubr.msk.bf16.mxu0 %vm3632_vm0, %v3631_v0 }
 0x577   :  { %3223 = vmatprep.subr.bf16.mxu0 %v3631_v0 }
 0x57d   :  { %3214 = vmatmul.mubr.msk.bf16.vlgmr.msra.gmra.mxu0 %vm732_vm2, %v1744_v21 }
 0x57e   :  { %3225 = vmatprep.mubr.msk.bf16.mxu0 %vm3632_vm0, %v3631_v0 }
 0x58e   :  { %v1429_v24 = vpop.xlane.xlu1 %1428 }
 0x58f   :  { %3415 = vrcp.f32 %v1429_v24 }
 0x592   :  { %v1694_v30 = vpop.permute.xlu1 %1693 }
 0x596   :  { %v1796_v33 = vpop.permute.xlu1 %1795 }
 0x597   :  { %v1801_v34 = vsel %vm732_vm2, %v1796_v33, 0 }
 0x59a   :  { %v1794_v36 = vpop.permute.xlu1 %1793 }
 0x59c   :  { %v3416_v25 = vpop.eup %3415 }
 0x59d   :  { %v1437_v26 = vmul.f32 %v3416_v25, %v3408_v45 }
 0x59f   :  { %1442 = vst.msk [vmem:[#allocation14 + $0x68] sm:$0xff] %vm732_vm2, %v1437_v26  ;;  %v1446_v29 = vpack.c.bf16 %v1437_v26, %v1437_v26 }
 0x5a1   :  { %3196 = vmatmul.mubr.msk.bf16.vlgmr.msra.gmra.mxu1 %vm732_vm2, %v1446_v29 }
 0x5a2   :  { %3206 = vmatpush3.bf16.xpose.msra.mxu1 %v1701_v32  ;;  %3207 = vmatprep.mubr.msk.bf16.mxu1 %vm3632_vm0, %v3631_v0 }
 0x5a3   :  { %3217 = vmatprep.subr.bf16.mxu1 %v3631_v0 }
 0x5a9   :  { %3208 = vmatmul.mubr.msk.bf16.vlgmr.msra.gmra.mxu1 %vm732_vm2, %v1694_v30 }
 0x5aa   :  { %3218 = vmatpush3.bf16.xpose.msra.mxu1 %v1801_v34  ;;  %3219 = vmatprep.mubr.msk.bf16.mxu1 %vm3632_vm0, %v3631_v0 }
 0x5ab   :  { %3229 = vmatprep.subr.bf16.mxu1 %v3631_v0 }
 0x5b1   :  { %3220 = vmatmul.mubr.msk.bf16.vlgmr.msra.gmra.mxu1 %vm732_vm2, %v1794_v36 }
 0x5b2   :  { %3231 = vmatprep.mubr.msk.bf16.mxu1 %vm3632_vm0, %v3631_v0 }
 0x5f7   :  { %v4064_v37 = vpop.f32.mrf.mxu0 }
 0x5f9   :  { %v3179_v38 = vpop.f32.mrf.mxu0 }
 0x5fb   :  { %v1493_v39 = vpop.f32.mrf.mxu0 }
 0x5fd   :  { %v3180_v40 = vpop.f32.mrf.mxu0 }
 0x62c   :  { %v4066_v41 = vpop.f32.mrf.mxu1 }
 0x62d   :  { %v3347_v42 = vpack.i.bf16 %v4066_v41, %v4064_v37  ;;  %v4070_v43 = vpop.f32.mrf.mxu0 }
 0x62e   :  { %v3185_v45 = vpop.f32.mrf.mxu1 }
 0x62f   :  { %v3191_v46 = vpop.f32.mrf.mxu0 }
 0x630   :  { %v1542_v47 = vpop.f32.mrf.mxu1 }
 0x631   :  { %v1591_v51 = vpop.f32.mrf.mxu0 }
 0x632   :  { %v3186_v52 = vpop.f32.mrf.mxu1 }
 0x633   :  { %v3192_v54 = vpop.f32.mrf.mxu0 }
 0x635   :  { %v1687_v55 = vpop.f32.mrf.mxu0 }
 0x636   :  { %v1843_v56 = vsel %vm3874_vm7, %v1687_v55, -1.767767e+19 }
 0x637   :  { %v3203_v59 = vpop.f32.mrf.mxu0  ;;  %v1847_v23 = vsel %vm732_vm2, %v1843_v56, -inf }
 0x638   :  { %1848 = vmax.xlane.f32.xlu0 %v1847_v23 }
 0x639   :  { %v1690_v60 = vpop.f32.mrf.mxu0 }
 0x63b   :  { %v3204_v27 = vpop.f32.mrf.mxu0 }
 0x63d   :  { %v1787_v2 = vpop.f32.mrf.mxu0 }
 0x63e   :  { %v1845_v3 = vsel %vm3888_vm10, %v1787_v2, -1.767767e+19 }
 0x63f   :  { %v3215_v4 = vpop.f32.mrf.mxu0  ;;  %v1853_v6 = vsel %vm732_vm2, %v1845_v3, -inf }
 0x640   :  { %1854 = vmax.xlane.f32.xlu0 %v1853_v6 }
 0x641   :  { %v1790_v7 = vpop.f32.mrf.mxu0 }
 0x643   :  { %v3216_v9 = vpop.f32.mrf.mxu0 }
 0x661   :  { %v4078_v12 = vpop.f32.mrf.mxu1 }
 0x662   :  { %v3362_v14 = vpack.i.bf16 %v4078_v12, %v4070_v43 }
 0x663   :  { %v3197_v15 = vpop.f32.mrf.mxu1 }
 0x665   :  { %v1640_v16 = vpop.f32.mrf.mxu1 }
 0x667   :  { %v3198_v17 = vpop.f32.mrf.mxu1 }
 0x669   :  { %v1737_v19 = vpop.f32.mrf.mxu1 }
 0x66a   :  { %v1844_v20 = vsel %vm3878_vm9, %v1737_v19, -1.767767e+19 }
 0x66b   :  { %v3209_v21 = vpop.f32.mrf.mxu1  ;;  %v1850_v22 = vsel %vm732_vm2, %v1844_v20, -inf }
 0x66c   :  { %1851 = vmax.xlane.f32.xlu1 %v1850_v22 }
 0x66d   :  { %v1740_v24 = vpop.f32.mrf.mxu1 }
 0x66f   :  { %v3210_v25 = vpop.f32.mrf.mxu1 }
 0x671   :  { %v1837_v26 = vpop.f32.mrf.mxu1 }
 0x672   :  { %v1846_v29 = vsel %vm3892_vm11, %v1837_v26, -1.767767e+19 }
 0x673   :  { %v3221_v30 = vpop.f32.mrf.mxu1  ;;  %v1856_v32 = vsel %vm732_vm2, %v1846_v29, -inf }
 0x674   :  { %1857 = vmax.xlane.f32.xlu0 %v1856_v32 }
 0x675   :  { %v1840_v33 = vpop.f32.mrf.mxu1 }
 0x677   :  { %v3222_v34 = vpop.f32.mrf.mxu1 }
 0x67d   :  { %1948 = vrot.lane.b32.xlu1 %v3852_v18, %s3635_s5 }
 0x681   :  { %1996 = vrot.lane.b32.xlu1 %v3924_v53, %s3635_s5 }
 0x685   :  { %2044 = vrot.lane.b32.xlu1 %v3929_v57, %s3635_s5 }
 0x6c1   :  { %v1849_v36 = vpop.xlane.xlu0 %1848 }
 0x6c2   :  { %v1859_v38 = vsub.f32 %v1843_v56, %v1849_v36 }
 0x6c4   :  { %v1863_v39 = vmul.f32 1.442695, %v1859_v38 }
 0x6c6   :  { %3417 = vpow2.f32 %v1863_v39 }
 0x6c9   :  { %v1855_v46 = vpop.xlane.xlu0 %1854 }
 0x6ca   :  { %v1861_v47 = vsub.f32 %v1845_v3, %v1855_v46 }
 0x6cc   :  { %v1867_v51 = vmul.f32 1.442695, %v1861_v47 }
 0x6ce   :  { %3419 = vpow2.f32 %v1867_v51 }
 0x6d3   :  { %v3418_v40 = vpop.eup %3417 }
 0x6d4   :  { %v1871_v45 = vsel %vm732_vm2, %v3418_v40, 0.0 }
 0x6d5   :  { %1872 = vadd.xlane.f32.xlu0 %v1871_v45 }
 0x6db   :  { %v3420_v23 = vpop.eup %3419 }
 0x6dc   :  { %v1877_v2 = vsel %vm732_vm2, %v3420_v23, 0.0 }
 0x6eb   :  { %1900 = vrot.lane.b32.xlu0 %v3848_v13, %s3635_s5 }
 0x6f5   :  { %v1852_v52 = vpop.xlane.xlu1 %1851 }
 0x6f6   :  { %v1860_v54 = vsub.f32 %v1844_v20, %v1852_v52 }
 0x6f8   :  { %v1865_v55 = vmul.f32 1.442695, %v1860_v54 }
 0x6f9   :  { %v1949_v59 = vpop.permute.xlu1 %1948 }
 0x6fa   :  { %3421 = vpow2.f32 %v1865_v55  ;;  %v1954_v56 = vsel %vm1000_vm3, %v1949_v59, 0 }
 0x6fb   :  { %3230 = vmatpush3.bf16.msra.mxu1 %v1954_v56 }
 0x6fc   :  { %3241 = vmatprep.subr.bf16.mxu1 %v3631_v0 }
 0x6fd   :  { %v1858_v3 = vpop.xlane.xlu0 %1857  ;;  %v1997_v15 = vpop.permute.xlu1 %1996 }
 0x6fe   :  { %v1862_v4 = vsub.f32 %v1846_v29, %v1858_v3  ;;  %v2002_v16 = vsel %vm1000_vm3, %v1997_v15, 0 }
 0x700   :  { %v1869_v6 = vmul.f32 1.442695, %v1862_v4 }
 0x702   :  { %3423 = vpow2.f32 %v1869_v6 }
 0x707   :  { %v3422_v60 = vpop.eup %3421 }
 0x708   :  { %v1874_v27 = vsel %vm732_vm2, %v3422_v60, 0.0 }
 0x709   :  { %1875 = vadd.xlane.f32.xlu1 %v1874_v27 }
 0x70a   :  { %1878 = vadd.xlane.f32.xlu0 %v1877_v2 }
 0x70f   :  { %v3424_v7 = vpop.eup %3423 }
 0x710   :  { %v1880_v9 = vsel %vm732_vm2, %v3424_v7, 0.0 }
 0x71a   :  { %2144 = vrot.lane.b32.xlu1 %v3806_v50, %s3636_s13 }
 0x720   :  { %2094 = vrot.lane.b32.xlu0 %v3804_v49, %s3636_s13 }
 0x724   :  { %2092 = vrot.lane.b32.xlu0 %v3814_v61, %s3636_s13 }
 0x728   :  { %2194 = vrot.lane.b32.xlu0 %v3818_v63, %s3636_s13 }
 0x72c   :  { %2192 = vrot.lane.b32.xlu0 %v3836_v10, %s3636_s13 }
 0x73e   :  { %1881 = vadd.xlane.f32.xlu1 %v1880_v9 }
 0x74f   :  { %2142 = vrot.lane.b32.xlu1 %v3816_v62, %s3636_s13 }
 0x753   :  { %2244 = vrot.lane.b32.xlu1 %v3820_v1, %s3636_s13  ;;  %v2045_v1 = vpop.permute.xlu1 %2044 }
 0x754   :  { %v2050_v29 = vsel %vm1000_vm3, %v2045_v1, 0 }
 0x757   :  { %2242 = vrot.lane.b32.xlu1 %v3838_v11, %s3636_s13 }
 0x75e   :  { %v1873_v49 = vpop.xlane.xlu0 %1872 }
 0x75f   :  { %3425 = vrcp.f32 %v1873_v49 }
 0x762   :  { %v1901_v50 = vpop.permute.xlu0 %1900 }
 0x763   :  { %v1906_v61 = vsel %vm1000_vm3, %v1901_v50, 0 }
 0x764   :  { %3224 = vmatpush3.bf16.msra.mxu0 %v1906_v61 }
 0x765   :  { %3235 = vmatprep.subr.bf16.mxu0 %v3631_v0 }
 0x76c   :  { %v3426_v63 = vpop.eup %3425 }
 0x76d   :  { %v1887_v10 = vmul.f32 %v3426_v63, %v3418_v40 }
 0x76f   :  { %1892 = vst.msk [vmem:[#allocation14 + $0x10] sm:$0xff] %vm732_vm2, %v1887_v10  ;;  %v1896_v62 = vpack.c.bf16 %v1887_v10, %v1887_v10 }
 0x771   :  { %3226 = vmatmul.mubr.msk.bf16.vlgmr.msra.gmra.mxu0 %vm732_vm2, %v1896_v62 }
 0x772   :  { %3236 = vmatpush3.bf16.msra.mxu0 %v2002_v16  ;;  %3237 = vmatprep.mubr.msk.bf16.mxu0 %vm3632_vm0, %v3631_v0 }
 0x773   :  { %3247 = vmatprep.subr.bf16.mxu0 %v3631_v0 }
 0x792   :  { %v1876_v11 = vpop.xlane.xlu1 %1875 }
 0x793   :  { %3427 = vrcp.f32 %v1876_v11  ;;  %v1879_v17 = vpop.xlane.xlu0 %1878 }
 0x794   :  { %3429 = vrcp.f32 %v1879_v17 }
 0x796   :  { %v2145_v38 = vpop.permute.xlu1 %2144 }
 0x797   :  { %v2095_v19 = vpop.permute.xlu0 %2094  ;;  %v2150_v51 = vsel %vm732_vm2, %v2145_v38, 0 }
 0x798   :  { %v2100_v32 = vsel %vm732_vm2, %v2095_v19, 0 }
 0x79b   :  { %v2093_v30 = vpop.permute.xlu0 %2092 }
 0x79f   :  { %v2195_v33 = vpop.permute.xlu0 %2194 }
 0x7a0   :  { %v3428_v20 = vpop.eup %3427  ;;  %v2200_v34 = vsel %vm732_vm2, %v2195_v33, 0 }
 0x7a1   :  { %v3430_v21 = vpop.eup %3429  ;;  %v1888_v22 = vmul.f32 %v3428_v20, %v3422_v60 }
 0x7a2   :  { %v1889_v24 = vmul.f32 %v3430_v21, %v3420_v23 }
 0x7a3   :  { %1893 = vst.msk [vmem:[#allocation14 + $0x30] sm:$0xff] %vm732_vm2, %v1888_v22  ;;  %v1897_v25 = vpack.c.bf16 %v1888_v22, %v1888_v22  ;;  %v2193_v36 = vpop.permute.xlu0 %2192 }
 0x7a4   :  { %1894 = vst.msk [vmem:[#allocation14 + $0x50] sm:$0xff] %vm732_vm2, %v1889_v24  ;;  %v1898_v26 = vpack.c.bf16 %v1889_v24, %v1889_v24 }
 0x7a5   :  { %3232 = vmatmul.mubr.msk.bf16.vlgmr.msra.gmra.mxu1 %vm732_vm2, %v1897_v25 }
 0x7a6   :  { %3238 = vmatmul.mubr.msk.bf16.vlgmr.msra.gmra.mxu0 %vm732_vm2, %v1898_v26  ;;  %3242 = vmatpush3.bf16.msra.mxu1 %v2050_v29 }
 0x7a7   :  { %3248 = vmatpush3.bf16.xpose.msra.mxu0 %v2100_v32  ;;  %3249 = vmatprep.mubr.msk.bf16.mxu0 %vm3632_vm0, %v3631_v0 }
 0x7a8   :  { %3259 = vmatprep.subr.bf16.mxu0 %v3631_v0  ;;  %3243 = vmatprep.mubr.msk.bf16.mxu1 %vm3632_vm0, %v3631_v0 }
 0x7a9   :  { %3253 = vmatprep.subr.bf16.mxu1 %v3631_v0 }
 0x7ae   :  { %3250 = vmatmul.mubr.msk.bf16.vlgmr.msra.gmra.mxu0 %vm732_vm2, %v2093_v30 }
 0x7af   :  { %3260 = vmatpush3.bf16.xpose.msra.mxu0 %v2200_v34  ;;  %3261 = vmatprep.mubr.msk.bf16.mxu0 %vm3632_vm0, %v3631_v0 }
 0x7b0   :  { %3271 = vmatprep.subr.bf16.mxu0 %v3631_v0 }
 0x7b6   :  { %3262 = vmatmul.mubr.msk.bf16.vlgmr.msra.gmra.mxu0 %vm732_vm2, %v2193_v36 }
 0x7b7   :  { %3273 = vmatprep.mubr.msk.bf16.mxu0 %vm3632_vm0, %v3631_v0 }
 0x7c7   :  { %v1882_v39 = vpop.xlane.xlu1 %1881 }
 0x7c8   :  { %3431 = vrcp.f32 %v1882_v39 }
 0x7cb   :  { %v2143_v47 = vpop.permute.xlu1 %2142 }
 0x7cf   :  { %v2245_v52 = vpop.permute.xlu1 %2244 }
 0x7d0   :  { %v2250_v54 = vsel %vm732_vm2, %v2245_v52, 0 }
 0x7d3   :  { %v2243_v55 = vpop.permute.xlu1 %2242 }
 0x7d5   :  { %v3432_v40 = vpop.eup %3431 }
 0x7d6   :  { %v1890_v45 = vmul.f32 %v3432_v40, %v3424_v7 }
 0x7d8   :  { %1895 = vst.msk [vmem:[#allocation14 + $0x70] sm:$0xff] %vm732_vm2, %v1890_v45  ;;  %v1899_v46 = vpack.c.bf16 %v1890_v45, %v1890_v45 }
 0x7da   :  { %3244 = vmatmul.mubr.msk.bf16.vlgmr.msra.gmra.mxu1 %vm732_vm2, %v1899_v46 }
 0x7db   :  { %3254 = vmatpush3.bf16.xpose.msra.mxu1 %v2150_v51  ;;  %3255 = vmatprep.mubr.msk.bf16.mxu1 %vm3632_vm0, %v3631_v0 }
 0x7dc   :  { %3265 = vmatprep.subr.bf16.mxu1 %v3631_v0 }
 0x7e2   :  { %3256 = vmatmul.mubr.msk.bf16.vlgmr.msra.gmra.mxu1 %vm732_vm2, %v2143_v47 }
 0x7e3   :  { %3266 = vmatpush3.bf16.xpose.msra.mxu1 %v2250_v54  ;;  %3267 = vmatprep.mubr.msk.bf16.mxu1 %vm3632_vm0, %v3631_v0 }
 0x7e4   :  { %3277 = vmatprep.subr.bf16.mxu1 %v3631_v0 }
 0x7ea   :  { %3268 = vmatmul.mubr.msk.bf16.vlgmr.msra.gmra.mxu1 %vm732_vm2, %v2243_v55 }
 0x7eb   :  { %3279 = vmatprep.mubr.msk.bf16.mxu1 %vm3632_vm0, %v3631_v0 }
 0x831   :  { %v4160_v59 = vpop.f32.mrf.mxu0 }
 0x833   :  { %v3227_v56 = vpop.f32.mrf.mxu0 }
 0x835   :  { %v1945_v23 = vpop.f32.mrf.mxu0 }
 0x837   :  { %v3228_v60 = vpop.f32.mrf.mxu0 }
 0x865   :  { %v4162_v27 = vpop.f32.mrf.mxu1 }
 0x866   :  { %v3352_v2 = vpack.i.bf16 %v4162_v27, %v4160_v59  ;;  %v4166_v3 = vpop.f32.mrf.mxu0 }
 0x867   :  { %v3233_v4 = vpop.f32.mrf.mxu1 }
 0x868   :  { %v3239_v6 = vpop.f32.mrf.mxu0 }
 0x869   :  { %v1993_v7 = vpop.f32.mrf.mxu1 }
 0x86a   :  { %v2041_v9 = vpop.f32.mrf.mxu0 }
 0x86b   :  { %v3234_v49 = vpop.f32.mrf.mxu1 }
 0x86c   :  { %v3240_v50 = vpop.f32.mrf.mxu0 }
 0x86e   :  { %v2136_v61 = vpop.f32.mrf.mxu0 }
 0x86f   :  { %v2292_v63 = vsel %vm3874_vm7, %v2136_v61, -1.767767e+19 }
 0x870   :  { %v3251_v10 = vpop.f32.mrf.mxu0  ;;  %v2296_v15 = vsel %vm732_vm2, %v2292_v63, -inf }
 0x871   :  { %2297 = vmax.xlane.f32.xlu0 %v2296_v15 }
 0x872   :  { %v2139_v62 = vpop.f32.mrf.mxu0 }
 0x874   :  { %v3252_v16 = vpop.f32.mrf.mxu0 }
 0x876   :  { %v2236_v1 = vpop.f32.mrf.mxu0 }
 0x877   :  { %v2294_v11 = vsel %vm3888_vm10, %v2236_v1, -1.767767e+19 }
 0x878   :  { %v3263_v17 = vpop.f32.mrf.mxu0  ;;  %v2302_v19 = vsel %vm732_vm2, %v2294_v11, -inf }
 0x879   :  { %2303 = vmax.xlane.f32.xlu0 %v2302_v19 }
 0x87a   :  { %v2239_v20 = vpop.f32.mrf.mxu0 }
 0x87c   :  { %v3264_v21 = vpop.f32.mrf.mxu0 }
 0x89a   :  { %v4174_v22 = vpop.f32.mrf.mxu1 }
 0x89b   :  { %v3367_v44 = vpack.i.bf16 %v4174_v22, %v4166_v3 }
 0x89c   :  { %v3245_v24 = vpop.f32.mrf.mxu1 }
 0x89e   :  { %v2089_v25 = vpop.f32.mrf.mxu1 }
 0x8a0   :  { %v3246_v26 = vpop.f32.mrf.mxu1 }
 0x8a2   :  { %v2186_v29 = vpop.f32.mrf.mxu1 }
 0x8a3   :  { %v2293_v30 = vsel %vm3878_vm9, %v2186_v29, -1.767767e+19  ;;  %v3383_v29 = vld [vmem:[#allocation11 + $0x8] sm:$0xff]  }
 0x8a4   :  { %v3257_v5 = vpop.f32.mrf.mxu1  ;;  %v2299_v32 = vsel %vm732_vm2, %v2293_v30, -inf }
 0x8a5   :  { %2300 = vmax.xlane.f32.xlu1 %v2299_v32 }
 0x8a6   :  { %v2189_v33 = vpop.f32.mrf.mxu1 }
 0x8a8   :  { %v3258_v34 = vpop.f32.mrf.mxu1 }
 0x8a9   :  { %v3384_v34 = vld [vmem:[#allocation11] sm:$0xff]  }
 0x8aa   :  { %v2286_v36 = vpop.f32.mrf.mxu1 }
 0x8ab   :  { %v2295_v38 = vsel %vm3892_vm11, %v2286_v36, -1.767767e+19 }
 0x8ac   :  { %v3269_v39 = vpop.f32.mrf.mxu1  ;;  %v2305_v40 = vsel %vm732_vm2, %v2295_v38, -inf }
 0x8ad   :  { %2306 = vmax.xlane.f32.xlu0 %v2305_v40 }
 0x8ae   :  { %v2289_v45 = vpop.f32.mrf.mxu1 }
 0x8b0   :  { %v3270_v46 = vpop.f32.mrf.mxu1 }
 0x8fa   :  { %v2298_v47 = vpop.xlane.xlu0 %2297 }
 0x8fb   :  { %v2308_v51 = vsub.f32 %v2292_v63, %v2298_v47 }
 0x8fd   :  { %v2312_v48 = vmul.f32 1.442695, %v2308_v51 }
 0x8ff   :  { %3433 = vpow2.f32 %v2312_v48 }
 0x902   :  { %v2304_v52 = vpop.xlane.xlu0 %2303 }
 0x903   :  { %v2310_v54 = vsub.f32 %v2294_v11, %v2304_v52 }
 0x905   :  { %v2316_v55 = vmul.f32 1.442695, %v2310_v54 }
 0x907   :  { %3435 = vpow2.f32 %v2316_v55 }
 0x90c   :  { %v3434_v56 = vpop.eup %3433 }
 0x90d   :  { %v2320_v23 = vsel %vm732_vm2, %v3434_v56, 0.0 }
 0x90e   :  { %2321 = vadd.xlane.f32.xlu0 %v2320_v23 }
 0x914   :  { %v3436_v8 = vpop.eup %3435 }
 0x915   :  { %v2326_v60 = vsel %vm732_vm2, %v3436_v8, 0.0 }
 0x916   :  { %2327 = vadd.xlane.f32.xlu0 %v2326_v60 }
 0x92c   :  { %2349 = vrot.lane.b32.xlu0 %v3848_v13, %s3636_s13 }
 0x92e   :  { %v2301_v4 = vpop.xlane.xlu1 %2300 }
 0x92f   :  { %v2309_v6 = vsub.f32 %v2293_v30, %v2301_v4 }
 0x930   :  { %3348 = vrot.lane.b32.xlu0 %v3347_v42, %s3624_s19 }
 0x931   :  { %v2314_v7 = vmul.f32 1.442695, %v2309_v6 }
 0x933   :  { %3437 = vpow2.f32 %v2314_v7 }
 0x936   :  { %v2307_v13 = vpop.xlane.xlu0 %2306 }
 0x937   :  { %v2311_v50 = vsub.f32 %v2295_v38, %v2307_v13 }
 0x939   :  { %v2318_v61 = vmul.f32 1.442695, %v2311_v50 }
 0x93b   :  { %3439 = vpow2.f32 %v2318_v61 }
 0x940   :  { %v3438_v9 = vpop.eup %3437 }
 0x941   :  { %v2323_v49 = vsel %vm732_vm2, %v3438_v9, 0.0 }
 0x942   :  { %2324 = vadd.xlane.f32.xlu1 %v2323_v49 }
 0x948   :  { %v3440_v63 = vpop.eup %3439 }
 0x949   :  { %v2329_v37 = vsel %vm732_vm2, %v3440_v63, 0.0 }
 0x953   :  { %2397 = vrot.lane.b32.xlu1 %v3852_v18, %s3636_s13 }
 0x957   :  { %2445 = vrot.lane.b32.xlu1 %v3924_v53, %s3636_s13 }
 0x97b   :  { %2330 = vadd.xlane.f32.xlu1 %v2329_v37 }
 0x98c   :  { %2493 = vrot.lane.b32.xlu1 %v3929_v57, %s3636_s13 }
 0x990   :  { %3353 = vrot.lane.b32.xlu1 %v3352_v2, %s3637_s14 }
 0x994   :  { %3363 = vrot.lane.b32.xlu1 %v3362_v14, %s3624_s19 }
 0x997   :  { %v2322_v18 = vpop.xlane.xlu0 %2321 }
 0x998   :  { %3441 = vrcp.f32 %v2322_v18 }
 0x99f   :  { %v2328_v53 = vpop.xlane.xlu0 %2327 }
 0x9a0   :  { %3443 = vrcp.f32 %v2328_v53 }
 0x9a3   :  { %v2350_v41 = vpop.permute.xlu0 %2349 }
 0x9a4   :  { %v2355_v42 = vsel %vm1000_vm3, %v2350_v41, 0 }
 0x9a5   :  { %v3442_v10 = vpop.eup %3441  ;;  %3272 = vmatpush3.bf16.msra.mxu0 %v2355_v42 }
 0x9a6   :  { %v2336_v57 = vmul.f32 %v3442_v10, %v3434_v56  ;;  %3283 = vmatprep.subr.bf16.mxu0 %v3631_v0 }
 0x9a8   :  { %2341 = vst.msk [vmem:[#allocation14 + $0x18] sm:$0xff] %vm732_vm2, %v2336_v57  ;;  %v2345_v59 = vpack.c.bf16 %v2336_v57, %v2336_v57 }
 0x9aa   :  { %3274 = vmatmul.mubr.msk.bf16.vlgmr.msra.gmra.mxu0 %vm732_vm2, %v2345_v59 }
 0x9ab   :  { %3285 = vmatprep.mubr.msk.bf16.mxu0 %vm3632_vm0, %v3631_v0 }
 0x9ad   :  { %v3444_v43 = vpop.eup %3443 }
 0x9ae   :  { %v2338_v12 = vmul.f32 %v3444_v43, %v3436_v8  ;;  %v3349_v8 = vpop.permute.xlu0 %3348 }
 0x9af   :  { %v3351_v4 = vunpack.i.h.bf16 %v3349_v8  ;;  %v3350_v6 = vunpack.i.l.bf16 %v3349_v8 }
 0x9b0   :  { %2343 = vst.msk [vmem:[#allocation14 + $0x58] sm:$0xff] %vm732_vm2, %v2338_v12  ;;  %v2347_v16 = vpack.c.bf16 %v2338_v12, %v2338_v12 }
 0x9b1   :  { %v2590_v13 = vsel %vm732_vm2, %v3974_v31, %v3351_v4  ;;  %v2589_v3 = vsel %vm732_vm2, %v3972_v28, %v3350_v6 }
 0x9cb   :  { %v2325_v14 = vpop.xlane.xlu1 %2324 }
 0x9cc   :  { %3445 = vrcp.f32 %v2325_v14 }
 0x9cf   :  { %v2398_v27 = vpop.permute.xlu1 %2397 }
 0x9d0   :  { %v2403_v2 = vsel %vm1000_vm3, %v2398_v27, 0 }
 0x9d1   :  { %3278 = vmatpush3.bf16.msra.mxu1 %v2403_v2 }
 0x9d2   :  { %3289 = vmatprep.subr.bf16.mxu1 %v3631_v0 }
 0x9d3   :  { %v2446_v15 = vpop.permute.xlu1 %2445 }
 0x9d4   :  { %v2451_v62 = vsel %vm1000_vm3, %v2446_v15, 0 }
 0x9d5   :  { %3284 = vmatpush3.bf16.msra.mxu0 %v2451_v62 }
 0x9d6   :  { %3295 = vmatprep.subr.bf16.mxu0 %v3631_v0 }
 0x9d8   :  { %3286 = vmatmul.mubr.msk.bf16.vlgmr.msra.gmra.mxu0 %vm732_vm2, %v2347_v16 }
 0x9d9   :  { %v3446_v1 = vpop.eup %3445  ;;  %3299 = vmatprep.mubr.msk.bf16.mxu0 %vm3632_vm0, %v3631_v0  ;;  %3296 = vmatpush3.bf16.msra.mxu0 %v3383_v29 }
 0x9da   :  { %v2337_v11 = vmul.f32 %v3446_v1, %v3438_v9  ;;  %3297 = vmatprep.subr.bf16.mxu0 %v3631_v0 }
 0x9dc   :  { %2342 = vst.msk [vmem:[#allocation14 + $0x38] sm:$0xff] %vm732_vm2, %v2337_v11  ;;  %v2346_v17 = vpack.c.bf16 %v2337_v11, %v2337_v11 }
 0x9dd   :  { %3298 = vmatpush3.bf16.msra.mxu0 %v3384_v34 }
 0x9de   :  { %3280 = vmatmul.mubr.msk.bf16.vlgmr.msra.gmra.mxu1 %vm732_vm2, %v2346_v17  ;;  %3311 = vmatprep.subr.bf16.mxu0 %v3631_v0 }
 0x9df   :  { %3291 = vmatprep.mubr.msk.bf16.mxu1 %vm3632_vm0, %v3631_v0 }
 0xa04   :  { %v2331_v19 = vpop.xlane.xlu1 %2330 }
 0xa05   :  { %3447 = vrcp.f32 %v2331_v19 }
 0xa08   :  { %v2494_v20 = vpop.permute.xlu1 %2493 }
 0xa09   :  { %v2499_v21 = vsel %vm1000_vm3, %v2494_v20, 0 }
 0xa0a   :  { %3290 = vmatpush3.bf16.msra.mxu1 %v2499_v21 }
 0xa0b   :  { %3303 = vmatprep.subr.bf16.mxu1 %v3631_v0 }
 0xa0c   :  { %v3354_v60 = vpop.permute.xlu1 %3353 }
 0xa0d   :  { %v3356_v7 = vunpack.i.h.bf16 %v3354_v60  ;;  %v3355_v9 = vunpack.i.l.bf16 %v3354_v60 }
 0xa0f   :  { %v2594_v50 = vsel %vm2593_vm12, %v2589_v3, %v3355_v9  ;;  %v2595_v61 = vsel %vm2593_vm12, %v2590_v13, %v3356_v7 }
 0xa10   :  { %v3364_v28 = vpop.permute.xlu1 %3363 }
 0xa11   :  { %v3366_v41 = vunpack.i.h.bf16 %v3364_v28  ;;  %v3365_v42 = vunpack.i.l.bf16 %v3364_v28 }
 0xa12   :  { %v3448_v24 = vpop.eup %3447 }
 0xa13   :  { %v2339_v25 = vmul.f32 %v3448_v24, %v3440_v63  ;;  %v2592_v43 = vsel %vm732_vm2, %v3984_v58, %v3366_v41  ;;  %v2591_v12 = vsel %vm732_vm2, %v3976_v35, %v3365_v42 }
 0xa15   :  { %2344 = vst.msk [vmem:[#allocation14 + $0x78] sm:$0xff] %vm732_vm2, %v2339_v25  ;;  %v2348_v26 = vpack.c.bf16 %v2339_v25, %v2339_v25 }
 0xa17   :  { %3292 = vmatmul.mubr.msk.bf16.vlgmr.msra.gmra.mxu1 %vm732_vm2, %v2348_v26 }
 0xa18   :  { %3307 = vmatprep.mubr.msk.bf16.mxu1 %vm3632_vm0, %v3631_v0  ;;  %3304 = vmatpush3.bf16.msra.mxu1 %v3383_v29 }
 0xa19   :  { %3305 = vmatprep.subr.bf16.mxu1 %v3631_v0 }
 0xa1c   :  { %3306 = vmatpush3.bf16.msra.mxu1 %v3384_v34 }
 0xa1d   :  { %3319 = vmatprep.subr.bf16.mxu1 %v3631_v0 }
 0xa6a   :  { %v2391_v30 = vpop.f32.mrf.mxu0 }
 0xa6c   :  { %v3275_v5 = vpop.f32.mrf.mxu0 }
 0xa6e   :  { %v2394_v32 = vpop.f32.mrf.mxu0 }
 0xa70   :  { %v3276_v33 = vpop.f32.mrf.mxu0 }
 0xa98   :  { %v2487_v36 = vpop.f32.mrf.mxu0 }
 0xa9a   :  { %v3287_v38 = vpop.f32.mrf.mxu0 }
 0xa9c   :  { %v2490_v39 = vpop.f32.mrf.mxu0 }
 0xa9e   :  { %v2439_v40 = vpop.f32.mrf.mxu1  ;;  %v3288_v45 = vpop.f32.mrf.mxu0 }
 0xa9f   :  { %v3357_v46 = vpack.i.bf16 %v2439_v40, %v2391_v30 }
 0xaa0   :  { %v3281_v47 = vpop.f32.mrf.mxu1 }
 0xaa1   :  { %3358 = vrot.lane.b32.xlu0 %v3357_v46, %s3638_s15 }
 0xaa2   :  { %v2442_v51 = vpop.f32.mrf.mxu1 }
 0xaa4   :  { %v3282_v48 = vpop.f32.mrf.mxu1 }
 0xaa5   :  { %3368 = vrot.lane.b32.xlu0 %v3367_v44, %s3637_s14 }
 0xad7   :  { %v2535_v52 = vpop.f32.mrf.mxu1 }
 0xad8   :  { %v3372_v54 = vpack.i.bf16 %v2535_v52, %v2487_v36 }
 0xad9   :  { %v3293_v55 = vpop.f32.mrf.mxu1 }
 0xada   :  { %3373 = vrot.lane.b32.xlu1 %v3372_v54, %s3638_s15 }
 0xadb   :  { %v2538_v56 = vpop.f32.mrf.mxu1 }
 0xadd   :  { %v3294_v23 = vpop.f32.mrf.mxu1 }
 0xb13   :  { %v3359_v49 = vpop.permute.xlu0 %3358 }
 0xb14   :  { %v3361_v22 = vunpack.i.h.bf16 %v3359_v49  ;;  %v3360_v44 = vunpack.i.l.bf16 %v3359_v49 }
 0xb16   :  { %v2600_v63 = vsel %vm2598_vm13, %v2595_v61, %v3361_v22  ;;  %v2599_v37 = vsel %vm2598_vm13, %v2594_v50, %v3360_v44 }
 0xb17   :  { %v2604_v18 = vpack.c.bf16 %v2600_v63, %v2600_v63  ;;  %v2603_v53 = vpack.c.bf16 %v2599_v37, %v2599_v37  ;;  %v3369_v31 = vpop.permute.xlu0 %3368 }
 0xb18   :  { %v3371_v10 = vunpack.i.h.bf16 %v3369_v31  ;;  %v3370_v57 = vunpack.i.l.bf16 %v3369_v31 }
 0xb19   :  { %3300 = vmatmul.mubr.msk.bf16.vlgmr.msra.gmra.mxu0 %vm179_vm1, %v2603_v53  ;;  %3308 = vmatmul.mubr.msk.bf16.vlgmr.msra.gmra.mxu1 %vm179_vm1, %v2604_v18 }
 0xb1a   :  { %3312 = vmatpush3.bf16.msra.mxu0 %v3383_v29  ;;  %3320 = vmatpush3.bf16.msra.mxu1 %v3383_v29  ;;  %v2597_v2 = vsel %vm2593_vm12, %v2592_v43, %v3371_v10 }
 0xb1b   :  { %3313 = vmatprep.subr.bf16.mxu0 %v3631_v0  ;;  %3321 = vmatprep.subr.bf16.mxu1 %v3631_v0 }
 0xb1c   :  { %3315 = vmatprep.mubr.msk.bf16.mxu0 %vm3632_vm0, %v3631_v0  ;;  %3323 = vmatprep.mubr.msk.bf16.mxu1 %vm3632_vm0, %v3631_v0  ;;  %v2596_v0 = vsel %vm2593_vm12, %v2591_v12, %v3370_v57 }
 0xb1e   :  { %3314 = vmatpush3.bf16.msra.mxu0 %v3384_v34  ;;  %3322 = vmatpush3.bf16.msra.mxu1 %v3384_v34 }
 0xb4c   :  { %v3374_v59 = vpop.permute.xlu1 %3373 }
 0xb4d   :  { %v3376_v14 = vunpack.i.h.bf16 %v3374_v59  ;;  %v3375_v27 = vunpack.i.l.bf16 %v3374_v59 }
 0xb4f   :  { %v2602_v15 = vsel %vm2598_vm13, %v2597_v2, %v3376_v14  ;;  %v2601_v62 = vsel %vm2598_vm13, %v2596_v0, %v3375_v27 }
 0xb50   :  { %v2606_v16 = vpack.c.bf16 %v2602_v15, %v2602_v15  ;;  %v2605_v1 = vpack.c.bf16 %v2601_v62, %v2601_v62 }
 0xb52   :  { %3316 = vmatmul.mubr.msk.bf16.vlgmr.msra.gmra.mxu0 %vm179_vm1, %v2605_v1  ;;  %3324 = vmatmul.mubr.msk.bf16.vlgmr.msra.gmra.mxu1 %vm179_vm1, %v2606_v16 }
 0xb53   :  { %3580 = shalt.err (!%p3577_p6)
}
 0xb54   :  { %2825 = dma.vmem_to_hbm [thread:$0]  %s2820_s17, 2048, %s4295_s10, [#allocation15], %s3623_s18, %s3623_s18, %s3624_s19  }
 0xb55   :  { %v2888_v35 = vld [vmem:[%s4293_s8] ss:$0 sm:$0xff]  ;;  %s3640_s25 = smov [#allocation13]  }
 0xb56   :  { %s2807_s10 = sshll.u32 %s3640_s25, 4  ;;  %s2808_s10 = int_to_ptr.vmem [resolvable:$true] %s2807_s10 }
 0xb57   :  { %s3589_s8 = scalar_lea.vmem %s2808_s10, 512  ;;  %p3594_p8 = scmp.lt.s32.totalorder %s2808_s10, %s2808_s10 }
 0xb58   :  { %p3590_p7 = scmp.ne.s32.totalorder %s2808_s10, %s3589_s8  ;;  %p3595_p9 = scmp.lt.s32.totalorder %s3589_s8, %s3589_s8 }
 0xb5a   :  { %p3596_p10 = por %p3595_p9, %p3594_p8 }
 0xb5c   :  { %p3597_p11 = pnand %p3596_p10, %p3590_p7 }
 0xbd9   :  { %v2663_v58 = vpop.f32.mrf.mxu0  ;;  %v2706_v11 = vpop.f32.mrf.mxu1 }
 0xbda   :  { %v2664_v17 = vadd.f32 %v2888_v35, %v2663_v58  ;;  %v2707_v19 = vadd.f32 %v2888_v35, %v2706_v11 }
 0xbdb   :  { %v3301_v20 = vpop.f32.mrf.mxu0  ;;  %v3309_v21 = vpop.f32.mrf.mxu1 }
 0xbdc   :  { %2798 = vst.msk [vmem:[#allocation13] sm:$0xff] %vm179_vm1, %v2664_v17  ;;  %2799 = vst.msk [vmem:[#allocation13 + $0x8] sm:$0xff] %vm179_vm1, %v2707_v19 }
 0xbdd   :  { %v2666_v24 = vpop.f32.mrf.mxu0  ;;  %v2709_v25 = vpop.f32.mrf.mxu1 }
 0xbdf   :  { %v3302_v26 = vpop.f32.mrf.mxu0  ;;  %v3310_v29 = vpop.f32.mrf.mxu1 }
 0xc12   :  { %v2749_v30 = vpop.f32.mrf.mxu0  ;;  %v2792_v5 = vpop.f32.mrf.mxu1 }
 0xc13   :  { %v2750_v32 = vadd.f32 %v2888_v35, %v2749_v30  ;;  %v2793_v33 = vadd.f32 %v2888_v35, %v2792_v5 }
 0xc14   :  { %v3317_v34 = vpop.f32.mrf.mxu0  ;;  %v3325_v36 = vpop.f32.mrf.mxu1 }
 0xc15   :  { %2800 = vst.msk [vmem:[#allocation13 + $0x10] sm:$0xff] %vm179_vm1, %v2750_v32  ;;  %2801 = vst.msk [vmem:[#allocation13 + $0x18] sm:$0xff] %vm179_vm1, %v2793_v33 }
 0xc16   :  { %v2752_v38 = vpop.f32.mrf.mxu0  ;;  %v2795_v39 = vpop.f32.mrf.mxu1 }
 0xc17   :  { %3600 = shalt.err (!%p3597_p11)
}
 0xc18   :  { %2813 = dma.vmem_to_hbm [thread:$0]  %s2808_s10, 512, %s4294_s9, [#allocation4], %s3623_s18, %s3623_s18, %s3624_s19   ;;  %v3318_v40 = vpop.f32.mrf.mxu0  ;;  %v3326_v45 = vpop.f32.mrf.mxu1 }
 0xc19   :  { %3617 = dma.done.wait [#allocation4], 512  }
 0xc1a   :  { %3618 = vsyncadd [#allocation4], 4294966784 }
 0xc1b   :  { %3619 = dma.done.wait [#allocation15], 2048  }
 0xc1c   :  { %3620 = vsyncadd [#allocation15], 4294965248 }
 0xc1d   :  { %2832 = vsyncpa [#allocation3], 1 }
 0xc1e   :  { %2833 = vsyncpa [#allocation6], 1 }
 0xc1f   :  { %2834 = vsyncpa [#allocation9], 1 }
 0xc20   :  { %2835 = vsyncpa [#allocation12], 1 }
 0xc21   :  { %2836 = vsyncpa [#allocation4], 1 }
 0xc22   :  { %2837 = vsyncpa [#allocation15], 1 }

</bundles_post_ra>
